<compile_context>
chip_gen: v7x
topology: tpu7x:2x2x1
jax: 0.10.0
libtpu: 0.0.40
codegen_flags: <defaults>
</compile_context>

<pallas_src>
import jax
import jax.numpy as jnp
from jax.experimental import pallas as pl
from jax.experimental.pallas import tpu as pltpu


def _conv3x3_kernel(x_ref, w_ref, o_ref):
    """One batch element.

    x_ref : (Cin, H+2, W+2)  zero-padded image, channel-major (VMEM)
    w_ref : (Cout, 9*Cin)    weight with taps+channels folded into one K axis
    o_ref : (Cout, H*W)      lane-dense output (H*W on the lane axis)
    """
    Cin, Hp, Wp = x_ref.shape
    H, W = Hp - 2, Wp - 2

    # Build the im2col slab once (9 statically shifted windows), then do a
    # single fused MXU matmul with K = 9*Cin instead of 9 K=Cin matmuls plus
    # 9 VALU accumulate adds.
    cols = []
    for kh in range(3):                     # static python loop -> unrolled
        for kw in range(3):
            patch = x_ref[:, kh:kh + H, kw:kw + W]       # (Cin, H, W)
            cols.append(patch.reshape(Cin, H * W))       # (Cin, H*W)
    slab = jnp.concatenate(cols, axis=0)                 # (9*Cin, H*W)

    # (Cout, 9*Cin) @ (9*Cin, H*W) -> (Cout, H*W), f32 accumulation on MXU.
    acc = jnp.dot(w_ref[...], slab, preferred_element_type=jnp.float32)
    o_ref[...] = acc.astype(o_ref.dtype)                 # unmasked dense store


def conv2d_basic(x_nchw, weight_oihw):
    """3x3 conv, stride 1, padding 1, dilation 1, groups 1, no bias.

    x: (N, Cin, H, W), weight: (Cout, Cin, 3, 3)  -> (N, Cout, H, W)
    """
    N, Cin, H, W = x_nchw.shape
    Cout, Cin_w, KH, KW = weight_oihw.shape
    assert (Cin_w, KH, KW) == (Cin, 3, 3)

    Hp, Wp = H + 2, W + 2
    # Input is already channel-major (NCHW): only the spatial zero-pad is
    # needed host-side (no layout transposes).
    x_pad = jnp.pad(x_nchw, ((0, 0), (0, 0), (1, 1), (1, 1)))   # (N,Cin,Hp,Wp)
    # (Cout, Cin, 3, 3) -> (Cout, 3, 3, Cin) -> (Cout, 9*Cin); row order
    # (kh, kw outer, ci inner) matches the slab built in the kernel.
    w2 = jnp.transpose(weight_oihw, (0, 2, 3, 1)).reshape(Cout, 9 * Cin)

    out_flat = pl.pallas_call(
        _conv3x3_kernel,
        out_shape=jax.ShapeDtypeStruct((N, Cout, H * W), x_nchw.dtype),
        grid_spec=pltpu.PrefetchScalarGridSpec(
            num_scalar_prefetch=0,
            grid=(N,),
            in_specs=[
                # one padded image per grid step (batch dim squeezed)
                pl.BlockSpec((None, Cin, Hp, Wp), lambda n: (n, 0, 0, 0)),
                # folded weight, resident every step
                pl.BlockSpec((Cout, 9 * Cin), lambda n: (0, 0)),
            ],
            out_specs=pl.BlockSpec((None, Cout, H * W), lambda n: (n, 0, 0)),
        ),
        compiler_params=pltpu.CompilerParams(
            dimension_semantics=("parallel",)),   # batch is independent (2 TCs on v7x)
    )(x_pad, w2)

    # (N, Cout, H*W) -> (N, Cout, H, W): pure reshape, already NCHW.
    return out_flat.reshape(N, Cout, H, W)


if __name__ == "__main__":
    key = jax.random.PRNGKey(0)
    kx, kw = jax.random.split(key)

    N, Cin, H, W = 2, 4, 16, 16
    Cout = 8

    x = jax.random.normal(kx, (N, Cin, H, W), dtype=jnp.float32)
    # deterministic kaiming-uniform-like init for nn.Conv2d weight (Cout,Cin,3,3)
    fan_in = Cin * 3 * 3
    bound = 1.0 / (fan_in ** 0.5)
    weight = jax.random.uniform(kw, (Cout, Cin, 3, 3),
                                minval=-bound, maxval=bound,
                                dtype=jnp.float32)

    out = conv2d_basic(x, weight)
    out = jax.block_until_ready(out)

    # reference check against XLA conv (same NCHW / OIHW semantics as PyTorch)
    ref = jax.lax.conv_general_dilated(
        x, weight, window_strides=(1, 1), padding=((1, 1), (1, 1)),
        dimension_numbers=("NCHW", "OIHW", "NCHW"))
    assert out.shape == (N, Cout, H, W)
    assert jnp.allclose(out, ref, atol=1e-4, rtol=1e-4)

    print("KERNEL_OK")
</pallas_src>

<mosaic_0001>
module attributes {stable_mosaic.version = 11 : i64} {
  func.func @_conv3x3_kernel(%arg0: i32, %arg1: memref<1x4x18x18xf32, #tpu.memory_space<vmem>>, %arg2: memref<8x36xf32, #tpu.memory_space<vmem>>, %arg3: memref<1x8x256xf32, #tpu.memory_space<vmem>>) attributes {dimension_semantics = [#tpu.dimension_semantics<parallel>], iteration_bounds = array<i64: 2>, scalar_prefetch = 0 : i64, scratch_operands = 0 : i64, tpu.core_type = #tpu.core_type<tc>, window_params = [{transform_indices = @transform_0, window_bounds = array<i64: 1, 4, 18, 18>}, {pipeline_mode = #tpu.pipeline_mode<synchronous>, transform_indices = @transform_1, window_bounds = array<i64: 8, 36>}, {transform_indices = @transform_2, window_bounds = array<i64: 1, 8, 256>}]} {
    %c0 = arith.constant 0 : index
    %c0_0 = arith.constant 0 : index
    %c0_1 = arith.constant 0 : index
    %c0_2 = arith.constant 0 : index
    %0 = vector.load %arg1[%c0, %c0_0, %c0_1, %c0_2] : memref<1x4x18x18xf32, #tpu.memory_space<vmem>>, vector<1x4x16x16xf32>
    %1 = vector.shape_cast %0 : vector<1x4x16x16xf32> to vector<4x16x16xf32>
    %2 = vector.shape_cast %1 : vector<4x16x16xf32> to vector<4x256xf32>
    %c0_3 = arith.constant 0 : index
    %c0_4 = arith.constant 0 : index
    %c0_5 = arith.constant 0 : index
    %c1 = arith.constant 1 : index
    %3 = vector.load %arg1[%c0_3, %c0_4, %c0_5, %c1] : memref<1x4x18x18xf32, #tpu.memory_space<vmem>>, vector<1x4x16x16xf32>
    %4 = vector.shape_cast %3 : vector<1x4x16x16xf32> to vector<4x16x16xf32>
    %5 = vector.shape_cast %4 : vector<4x16x16xf32> to vector<4x256xf32>
    %c0_6 = arith.constant 0 : index
    %c0_7 = arith.constant 0 : index
    %c0_8 = arith.constant 0 : index
    %c2 = arith.constant 2 : index
    %6 = vector.load %arg1[%c0_6, %c0_7, %c0_8, %c2] : memref<1x4x18x18xf32, #tpu.memory_space<vmem>>, vector<1x4x16x16xf32>
    %7 = vector.shape_cast %6 : vector<1x4x16x16xf32> to vector<4x16x16xf32>
    %8 = vector.shape_cast %7 : vector<4x16x16xf32> to vector<4x256xf32>
    %c0_9 = arith.constant 0 : index
    %c0_10 = arith.constant 0 : index
    %c1_11 = arith.constant 1 : index
    %c0_12 = arith.constant 0 : index
    %9 = vector.load %arg1[%c0_9, %c0_10, %c1_11, %c0_12] : memref<1x4x18x18xf32, #tpu.memory_space<vmem>>, vector<1x4x16x16xf32>
    %10 = vector.shape_cast %9 : vector<1x4x16x16xf32> to vector<4x16x16xf32>
    %11 = vector.shape_cast %10 : vector<4x16x16xf32> to vector<4x256xf32>
    %c0_13 = arith.constant 0 : index
    %c0_14 = arith.constant 0 : index
    %c1_15 = arith.constant 1 : index
    %c1_16 = arith.constant 1 : index
    %12 = vector.load %arg1[%c0_13, %c0_14, %c1_15, %c1_16] : memref<1x4x18x18xf32, #tpu.memory_space<vmem>>, vector<1x4x16x16xf32>
    %13 = vector.shape_cast %12 : vector<1x4x16x16xf32> to vector<4x16x16xf32>
    %14 = vector.shape_cast %13 : vector<4x16x16xf32> to vector<4x256xf32>
    %c0_17 = arith.constant 0 : index
    %c0_18 = arith.constant 0 : index
    %c1_19 = arith.constant 1 : index
    %c2_20 = arith.constant 2 : index
    %15 = vector.load %arg1[%c0_17, %c0_18, %c1_19, %c2_20] : memref<1x4x18x18xf32, #tpu.memory_space<vmem>>, vector<1x4x16x16xf32>
    %16 = vector.shape_cast %15 : vector<1x4x16x16xf32> to vector<4x16x16xf32>
    %17 = vector.shape_cast %16 : vector<4x16x16xf32> to vector<4x256xf32>
    %c0_21 = arith.constant 0 : index
    %c0_22 = arith.constant 0 : index
    %c2_23 = arith.constant 2 : index
    %c0_24 = arith.constant 0 : index
    %18 = vector.load %arg1[%c0_21, %c0_22, %c2_23, %c0_24] : memref<1x4x18x18xf32, #tpu.memory_space<vmem>>, vector<1x4x16x16xf32>
    %19 = vector.shape_cast %18 : vector<1x4x16x16xf32> to vector<4x16x16xf32>
    %20 = vector.shape_cast %19 : vector<4x16x16xf32> to vector<4x256xf32>
    %c0_25 = arith.constant 0 : index
    %c0_26 = arith.constant 0 : index
    %c2_27 = arith.constant 2 : index
    %c1_28 = arith.constant 1 : index
    %21 = vector.load %arg1[%c0_25, %c0_26, %c2_27, %c1_28] : memref<1x4x18x18xf32, #tpu.memory_space<vmem>>, vector<1x4x16x16xf32>
    %22 = vector.shape_cast %21 : vector<1x4x16x16xf32> to vector<4x16x16xf32>
    %23 = vector.shape_cast %22 : vector<4x16x16xf32> to vector<4x256xf32>
    %c0_29 = arith.constant 0 : index
    %c0_30 = arith.constant 0 : index
    %c2_31 = arith.constant 2 : index
    %c2_32 = arith.constant 2 : index
    %24 = vector.load %arg1[%c0_29, %c0_30, %c2_31, %c2_32] : memref<1x4x18x18xf32, #tpu.memory_space<vmem>>, vector<1x4x16x16xf32>
    %25 = vector.shape_cast %24 : vector<1x4x16x16xf32> to vector<4x16x16xf32>
    %26 = vector.shape_cast %25 : vector<4x16x16xf32> to vector<4x256xf32>
    %27 = tpu.concatenate %2, %5, %8, %11, %14, %17, %20, %23, %26 in 0 : vector<4x256xf32>, vector<4x256xf32>, vector<4x256xf32>, vector<4x256xf32>, vector<4x256xf32>, vector<4x256xf32>, vector<4x256xf32>, vector<4x256xf32>, vector<4x256xf32> -> vector<36x256xf32>
    %c0_33 = arith.constant 0 : index
    %c0_34 = arith.constant 0 : index
    %28 = vector.load %arg2[%c0_33, %c0_34] : memref<8x36xf32, #tpu.memory_space<vmem>>, vector<8x36xf32>
    %cst = arith.constant dense<0.000000e+00> : vector<8x256xf32>
    %29 = tpu.matmul %28, %27, %cst {dimension_numbers = #tpu.dot_dimension_numbers<[1], [0], [0], [1], [0, 0, 1, 1], [], []>} : vector<8x36xf32>, vector<36x256xf32>, vector<8x256xf32> -> vector<8x256xf32>
    %c0_35 = arith.constant 0 : index
    %c0_36 = arith.constant 0 : index
    %c0_37 = arith.constant 0 : index
    %30 = vector.load %arg3[%c0_35, %c0_36, %c0_37] : memref<1x8x256xf32, #tpu.memory_space<vmem>>, vector<1x8x256xf32>
    %31 = vector.shape_cast %30 : vector<1x8x256xf32> to vector<8x256xf32>
    %32 = vector.shape_cast %29 : vector<8x256xf32> to vector<1x8x256xf32>
    tpu.vector_store %arg3[%c0_35, %c0_36, %c0_37], %32 {strides = array<i32>} : memref<1x8x256xf32, #tpu.memory_space<vmem>>, vector<1x8x256xf32>,
    return
  }
  func.func @transform_0(%arg0: i32) -> (i32, i32, i32, i32) {
    %c0_i32 = arith.constant 0 : i32
    %c0_i32_0 = arith.constant 0 : i32
    %c0_i32_1 = arith.constant 0 : i32
    %c0_i32_2 = arith.constant 0 : i32
    return %arg0, %c0_i32, %c0_i32_0, %c0_i32_1 : i32, i32, i32, i32
  }
  func.func @transform_1(%arg0: i32) -> (i32, i32) {
    %c0_i32 = arith.constant 0 : i32
    %c0_i32_0 = arith.constant 0 : i32
    %c0_i32_1 = arith.constant 0 : i32
    return %c0_i32, %c0_i32_0 : i32, i32
  }
  func.func @transform_2(%arg0: i32) -> (i32, i32, i32) {
    %c0_i32 = arith.constant 0 : i32
    %c0_i32_0 = arith.constant 0 : i32
    %c0_i32_1 = arith.constant 0 : i32
    return %arg0, %c0_i32, %c0_i32_0 : i32, i32, i32
  }
}

</mosaic_0001>

<bundles_post_ra>
// kernel: tpu_custom_call.1
= control target key start
LH: loop header
LB: loop body
LE: loop exit
PB: predicated region body
PF: predicated region fallthrough
CT: control target
= control target key end

     0   :  { %7 = vsyncpa [#allocation3], 0  ;;  %s4317_s0 = inlined_call_operand.vmem [shape: f32[2,4,18,18], index: 0, kind: input, shape index: {}]   ;;  %s4318_s1 = inlined_call_operand.vmem [shape: f32[8,36], index: 1, kind: input, shape index: {}]   ;;  %s4319_s2 = inlined_call_operand.hbm [shape: f32[2,8,256], index: 2, kind: output, shape index: {}]  }
   0x1   :  { %9 = vsyncpa [#allocation3 + $0x1], 0  ;;  %s2857_s9 = smov 0   ;;  %s2859_s10 = smov 0  }
   0x2   :  { %s2861_s11 = smov 0   ;;  %s2863_s12 = smov 0  }
   0x3 LB: > { %s2878_s13 = sadd.s32 4294967295, %s2827_s12   ;;  %s2386_s14 = sadd.s32 4294967294, %s2827_s12   ;;  %s2827_s12 = sphi %s2863_s12, %s4400_s12   ;;  %s2823_s11 = sphi %s2861_s11, %s4399_s11   ;;  %s2819_s10 = sphi %s2859_s10, %s4398_s10   ;;  %s2815_s9 = sphi %s2857_s9, %s4397_s9  }
   0x4   : > { %s2882_s15 = sadd.s32 1, %s2827_s12   ;;  %s69_s16 = sadd.s32 1, %s2823_s11 }
   0x5   : > { %s66_s17 = ssub.s32 %s2827_s12, %s2882_s15  ;;  %p79_p0 = scmp.ne.s32.totalorder %s2823_s11, %s2819_s10 }
   0x6   : > { %p67_p1 = scmp.eq.s32.totalorder %s66_s17, 0  ;;  %p80_p2 = scmp.eq.s32.totalorder %s2878_s13, 1 }
   0x7   : > { %p85_p3 = scmp.ne.s32.totalorder %s2819_s10, %s2815_s9  ;;  %p86_p4 = scmp.eq.s32.totalorder %s2386_s14, 1 }
   0x8   : > { %s2893_s18 = scalar_select %p67_p1, %s2823_s11, %s69_s16  }
   0x9   : > { %p2895_p5 = por %p80_p2, %p79_p0  ;;  %p2899_p6 = por %p86_p4, %p85_p3 }
   0xa   : > { %p2389_p7 = scmp.ge.s32.totalorder %s2827_s12, 1  ;;  %p115_p8 = scmp.lt.s32.totalorder %s2827_s12, 3 }
   0xc   : > { %p116_p9 = pnand %p2389_p7, %p115_p8 }
   0xe   : > { %119 = sbr.rel (%p116_p9) target bundleno = 660 (0x294), region = 28 }
  0x15   : > { %p137_p10 = scmp.lt.s32.totalorder %s2878_s13, 1  ;;  %v2829_v0 = vmov 1983009808   ;;  %v155_v2 = vlaneseq  ;;  %s2830_s26 = smov 127   ;;  %v4328_v13 = vmov 0.0   ;;  %vm342_vm0 = vcmask 130048  }
  0x16   : > { %v153_v1 = vunpack.c.l.s4 %v2829_v0  ;;  %2303 = vmatprep.mubr.f32.mxu0 %v4328_v13  ;;  %s2832_s27 = smov 126   ;;  %s2834_s28 = smov 32   ;;  %vm344_vm1 = vcmask 261120   ;;  %vm346_vm2 = vcmask 392192   ;;  %vm348_vm3 = vcmask 523264  }
  0x17   : > { %s138_s21 = scalar_select %p137_p10, %s2878_s13, 1  ;;  %v2939_v15 = vshrl.u32 %v155_v2, 7  ;;  %vm350_vm4 = vcmask 654336   ;;  %vm352_vm5 = vcmask 785408   ;;  %vm354_vm6 = vcmask 916480  }
  0x18   : > { %v154_v14 = vunpack.c.0.s8 %v153_v1  ;;  %s2835_s29 = smov 64   ;;  %s2836_s30 = smov 16   ;;  %vm2219_vm7 = vcmask 1043456   ;;  %vm2229_vm8 = vcmask 293888  }
  0x19   : > { %s2409_s22 = smul.u32 96, %s138_s21  ;;  %s2837_s3 = smov 48  }
  0x1a   : > { %v2977_v29 = vsub.s32 %v154_v14, %v2939_v15  ;;  %s2838_s4 = smov 96   ;;  %s2839_s5 = smov 80  }
  0x1b   : > { %s2910_s25 = scalar_lea.vmem %s4317_s0, %s2409_s22  ;;  %s2840_s6 = smov 112  }
  0x1c   : > { %v2913_v3 = vld [vmem:[%s2910_s25 + $0x38] sm:$0xff]  ;;  %v2916_v4 = vld [vmem:[%s2910_s25 + $0x8] sm:$0xff]  ;;  %v2927_v7 = vld [vmem:[%s2910_s25 + $0x50] sm:$0xff]  ;;  %s134_s14 = sand.u32 1, %s2819_s10   ;;  %s2400_s22 = sshll.u32 %s2878_s13, 8 }
  0x1d   : > { %381 = vrot.lane.b32.xlu1 %v2913_v3, %s2830_s26  ;;  %373 = vrot.lane.b32.xlu0 %v2916_v4, %s2830_s26  ;;  %v218_v5 = vcombine.low %v2916_v4, %v2913_v3  ;;  %v219_v6 = vcombine.high %v2916_v4, %v2913_v3  ;;  %v145_v8 = vld [vmem:[%s2910_s25 + $0x20] sm:$0xff]  ;;  %v2933_v11 = vld [vmem:[%s2910_s25 + $0x18] sm:$0xff]  ;;  %s2390_s16 = sshll.u32 %s134_s14, 4  ;;  %s2841_s13 = smov [#allocation2]  }
  0x1e   : > { %v234_v9 = vcombine.low %v145_v8, %v2927_v7  ;;  %v235_v10 = vcombine.high %v145_v8, %v2927_v7  ;;  %v2936_v12 = vld [vmem:[%s2910_s25 + $0x48] sm:$0xff]  ;;  %v2942_v16 = vld [vmem:[%s2910_s25] sm:$0xff]  ;;  %v2949_v19 = vld [vmem:[%s2910_s25 + $0x30] sm:$0xff]  ;;  %s136_s17 = scalar_lea.vmem [#allocation2], %s2390_s16 }
  0x1f   : > { %v166_v17 = vcombine.low %v2933_v11, %v2936_v12  ;;  %v167_v18 = vcombine.high %v2933_v11, %v2936_v12  ;;  %v150_v20 = vcombine.low %v2942_v16, %v2949_v19  ;;  %v151_v21 = vcombine.high %v2942_v16, %v2949_v19  ;;  %v2956_v22 = vld [vmem:[%s2910_s25 + $0x21] sm:$0xff]  ;;  %v2959_v23 = vld [vmem:[%s2910_s25 + $0x51] sm:$0xff]  ;;  %v2965_v24 = vld [vmem:[%s2910_s25 + $0x9] sm:$0xff]  ;;  %s2327_s21 = sshll.u32 %s136_s17, 4  ;;  %s4272_s21 = int_to_ptr.vmem [resolvable:$true] %s2327_s21 }
  0x20   : > { %v923_v25 = vcombine.low %v2956_v22, %v2959_v23  ;;  %v2970_v26 = vld [vmem:[%s2910_s25 + $0x39] sm:$0xff]  ;;  %v924_v27 = vcombine.high %v2956_v22, %v2959_v23  ;;  %v2982_v31 = vrot.slane %v218_v5, %v2977_v29  ;;  %v2985_v32 = vrot.slane %v234_v9, %v2977_v29  ;;  %v2995_v34 = vld [vmem:[%s2910_s25 + $0x49] sm:$0xff]  ;;  %v3004_v37 = vld [vmem:[%s2910_s25 + $0x1] sm:$0xff] }
  0x21   : > { %385 = vrot.lane.b32.xlu1 %v2927_v7, %s2830_s26  ;;  %377 = vrot.lane.b32.xlu0 %v145_v8, %s2830_s26  ;;  %v907_v28 = vcombine.low %v2965_v24, %v2970_v26  ;;  %v908_v30 = vcombine.high %v2965_v24, %v2970_v26  ;;  %v2992_v33 = vld [vmem:[%s2910_s25 + $0x19] sm:$0xff]  ;;  %v3011_v40 = vld [vmem:[%s2910_s25 + $0x31] sm:$0xff]  ;;  %v3024_v45 = vrot.slane %v219_v6, %v2977_v29 }
  0x22   : > { %v2998_v35 = vrot.slane %v923_v25, %v2977_v29  ;;  %v855_v38 = vcombine.low %v2992_v33, %v2995_v34  ;;  %v856_v39 = vcombine.high %v2992_v33, %v2995_v34  ;;  %v3014_v41 = vrot.slane %v924_v27, %v2977_v29  ;;  %v3123_v9 = vld [vmem:[%s2910_s25 + $0x52] sm:$0xff]  ;;  %v3151_v14 = vld [vmem:[%s2910_s25 + $0x4a] sm:$0xff] }
  0x23   : > { %v3001_v36 = vrot.slane %v907_v28, %v2977_v29  ;;  %v3017_v42 = vrot.slane %v908_v30, %v2977_v29  ;;  %v839_v43 = vcombine.low %v3004_v37, %v3011_v40  ;;  %v840_v44 = vcombine.high %v3004_v37, %v3011_v40  ;;  %4347 = vst [vmem:[#allocation7_spill] sm:$0xff] %v3151_v14 }
  0x24   : > { %v3027_v46 = vrot.slane %v235_v10, %v2977_v29  ;;  %v3030_v47 = vrot.slane %v855_v38, %v2977_v29  ;;  %v3033_v48 = vrot.slane %v856_v39, %v2977_v29  ;;  %v251_v53 = vcombine.high %v2982_v31, %v2985_v32  ;;  %v3126_v10 = vld [vmem:[%s2910_s25 + $0x3a] sm:$0xff] }
  0x25   : > { %375 = vrot.lane.b32.xlu1 %v2933_v11, %s2830_s26  ;;  %371 = vrot.lane.b32.xlu0 %v2942_v16, %s2830_s26  ;;  %v3040_v49 = vrot.slane %v839_v43, %v2977_v29  ;;  %v3043_v50 = vrot.slane %v840_v44, %v2977_v29  ;;  %v940_v51 = vcombine.high %v3001_v36, %v2998_v35 }
  0x26   : > { %4345 = vst [vmem:[#allocation5_spill] sm:$0xff] %v3027_v46  ;;  %v955_v54 = vcombine.low %v3017_v42, %v3014_v41  ;;  %v250_v56 = vcombine.low %v2982_v31, %v2985_v32  ;;  %v3062_v59 = vrot.slane %v166_v17, %v2977_v29  ;;  %v3065_v60 = vrot.slane %v150_v20, %v2977_v29 }
  0x27   : > { %v872_v52 = vcombine.high %v3040_v49, %v3030_v47  ;;  %v871_v55 = vcombine.low %v3040_v49, %v3030_v47  ;;  %v3071_v61 = vrot.slane %v167_v18, %v2977_v29  ;;  %v3074_v62 = vrot.slane %v151_v21, %v2977_v29 }
  0x28   : > { %v183_v1 = vcombine.high %v3065_v60, %v3062_v59  ;;  %v2833_v17 = vmov 1934713408  }
  0x29   : > { %383 = vrot.lane.b32.xlu1 %v2936_v12, %s2830_s26  ;;  %379 = vrot.lane.b32.xlu0 %v2949_v19, %s2830_s26  ;;  %v185_v18 = vunpack.c.l.s4 %v2833_v17 }
  0x2b   : > { %v186_v21 = vunpack.c.0.s8 %v185_v18 }
  0x2d   : > { %607 = vrot.lane.b32.xlu1 %v145_v8, %s2832_s27  ;;  %603 = vrot.lane.b32.xlu0 %v2916_v4, %s2832_s27  ;;  %v3116_v8 = vld [vmem:[%s2910_s25 + $0xa] sm:$0xff] }
  0x31   : > { %615 = vrot.lane.b32.xlu1 %v2927_v7, %s2832_s27  ;;  %611 = vrot.lane.b32.xlu0 %v2913_v3, %s2832_s27  ;;  %v3113_v7 = vld [vmem:[%s2910_s25 + $0x22] sm:$0xff] }
  0x35   : > { %605 = vrot.lane.b32.xlu1 %v2933_v11, %s2832_s27  ;;  %601 = vrot.lane.b32.xlu0 %v2942_v16, %s2832_s27  ;;  %v3141_v11 = vld [vmem:[%s2910_s25 + $0x1a] sm:$0xff]  ;;  %v3154_v16 = vld [vmem:[%s2910_s25 + $0x32] sm:$0xff] }
  0x36   : > { %4346 = vst [vmem:[#allocation6_spill] sm:$0xff] %v3141_v11 }
  0x39   : > { %613 = vrot.lane.b32.xlu1 %v2936_v12, %s2832_s27  ;;  %609 = vrot.lane.b32.xlu0 %v2949_v19, %s2832_s27  ;;  %v3144_v12 = vld [vmem:[%s2910_s25 + $0x2] sm:$0xff]  ;;  %s4277_s25 = scalar_lea.hbm %s4319_s2, %s2400_s22 }
  0x3d   : > { %1289 = vrot.lane.b32.xlu1 %v2956_v22, %s2832_s27  ;;  %1285 = vrot.lane.b32.xlu0 %v2965_v24, %s2832_s27 }
  0x41   : > { %1297 = vrot.lane.b32.xlu1 %v2959_v23, %s2832_s27  ;;  %1293 = vrot.lane.b32.xlu0 %v2970_v26, %s2832_s27 }
  0x45   : > { %1741 = vrot.lane.b32.xlu1 %v3113_v7, %s2830_s26  ;;  %1737 = vrot.lane.b32.xlu0 %v3116_v8, %s2830_s26 }
  0x49   : > { %1749 = vrot.lane.b32.xlu1 %v3123_v9, %s2830_s26  ;;  %1745 = vrot.lane.b32.xlu0 %v3126_v10, %s2830_s26 }
  0x4d   : > { %1287 = vrot.lane.b32.xlu1 %v2992_v33, %s2832_s27  ;;  %1283 = vrot.lane.b32.xlu0 %v3004_v37, %s2832_s27 }
  0x51   : > { %1295 = vrot.lane.b32.xlu1 %v2995_v34, %s2832_s27  ;;  %1291 = vrot.lane.b32.xlu0 %v3011_v40, %s2832_s27 }
  0x55   : > { %1739 = vrot.lane.b32.xlu1 %v3141_v11, %s2830_s26  ;;  %1735 = vrot.lane.b32.xlu0 %v3144_v12, %s2830_s26 }
  0x59   : > { %1747 = vrot.lane.b32.xlu1 %v3151_v14, %s2830_s26  ;;  %1743 = vrot.lane.b32.xlu0 %v3154_v16, %s2830_s26 }
  0x5d   : > { %1059 = vrot.lane.b32.xlu1 %v2956_v22, %s2830_s26  ;;  %1055 = vrot.lane.b32.xlu0 %v2965_v24, %s2830_s26 }
  0x61   : > { %1067 = vrot.lane.b32.xlu1 %v2959_v23, %s2830_s26  ;;  %1063 = vrot.lane.b32.xlu0 %v2970_v26, %s2830_s26  ;;  %v3193_v26 = vsub.s32 %v186_v21, %v2939_v15 }
  0x63   : > { %v3221_v3 = vrot.slane %v872_v52, %v3193_v26 }
  0x65   : > { %1057 = vrot.lane.b32.xlu1 %v2992_v33, %s2830_s26  ;;  %1053 = vrot.lane.b32.xlu0 %v3004_v37, %s2830_s26  ;;  %v3207_v37 = vrot.slane %v940_v51, %v3193_v26 }
  0x69   : > { %1065 = vrot.lane.b32.xlu1 %v2995_v34, %s2830_s26  ;;  %1061 = vrot.lane.b32.xlu0 %v3011_v40, %s2830_s26  ;;  %s2313_s26 = scalar_lea.sflag [#allocation3], %s134_s14 }
  0x6d   : > { %1967 = vrot.lane.b32.xlu0 %v3116_v8, %s2832_s27  ;;  %1971 = vrot.lane.b32.xlu1 %v3113_v7, %s2832_s27 }
  0x71   : > { %1975 = vrot.lane.b32.xlu0 %v3126_v10, %s2832_s27  ;;  %1979 = vrot.lane.b32.xlu1 %v3123_v9, %s2832_s27 }
  0x75   : > { %1965 = vrot.lane.b32.xlu0 %v3144_v12, %s2832_s27  ;;  %1969 = vrot.lane.b32.xlu1 %v3141_v11, %s2832_s27 }
  0x79   : > { %1973 = vrot.lane.b32.xlu0 %v3154_v16, %s2832_s27  ;;  %1977 = vrot.lane.b32.xlu1 %v3151_v14, %s2832_s27  ;;  %s2765_s27 = scalar_lea.vmem %s4272_s21, 256 }
  0x7a   : > { %p2766_p11 = scmp.ne.s32.totalorder %s4272_s21, %s2765_s27 }
  0x7c   : > { %p2767_p12 = pnand %p2766_p11, %p2895_p5 }
  0x7e   : > { %p2768_p13 = pneg %p2767_p12 }
  0x8f   : > { %v382_v19 = vpop.permute.xlu1 %381  ;;  %v374_v20 = vpop.permute.xlu0 %373 }
  0x90   : > { %v463_v22 = vcombine.low %v374_v20, %v382_v19 }
  0x92   : > { %v3196_v27 = vrot.slane %v463_v22, %v2977_v29 }
  0x93   : > { %v386_v23 = vpop.permute.xlu1 %385  ;;  %v378_v24 = vpop.permute.xlu0 %377 }
  0x94   : > { %v479_v25 = vcombine.low %v378_v24, %v386_v23  ;;  %v480_v21 = vcombine.high %v378_v24, %v386_v23 }
  0x96   : > { %v3199_v28 = vrot.slane %v479_v25, %v2977_v29 }
  0x97   : > { %v376_v30 = vpop.permute.xlu1 %375  ;;  %v372_v33 = vpop.permute.xlu0 %371 }
  0x98   : > { %v496_v34 = vcombine.high %v3196_v27, %v3199_v28 }
  0x9a   : > { %v3210_v15 = vrot.slane %v496_v34, %v3193_v26  ;;  %v464_v34 = vcombine.high %v374_v20, %v382_v19 }
  0x9b   : > { %v384_v38 = vpop.permute.xlu1 %383  ;;  %v380_v39 = vpop.permute.xlu0 %379 }
  0x9c   : > { %v411_v40 = vcombine.low %v376_v30, %v384_v38  ;;  %v395_v43 = vcombine.low %v372_v33, %v380_v39  ;;  %v2461_v44 = vpack.i.bf16 %v3207_v37, %v3210_v15  ;;  %v3230_v2 = vrot.slane %v464_v34, %v2977_v29 }
  0x9d   : > { %v412_v6 = vcombine.high %v376_v30, %v384_v38  ;;  %v396_v34 = vcombine.high %v372_v33, %v380_v39  ;;  %v3264_v33 = vrot.slane %v955_v54, %v3193_v26 }
  0x9e   : > { %v419_v17 = vrot.slane %v411_v40, %v2977_v29  ;;  %v403_v18 = vrot.slane %v395_v43, %v2977_v29  ;;  %2462 = vrot.lane.b32.xlu0 %v2461_v44, %s2834_s28  ;;  %v3227_v40 = vrot.slane %v480_v21, %v2977_v29 }
  0x9f   : > { %v608_v51 = vpop.permute.xlu1 %607  ;;  %v604_v22 = vpop.permute.xlu0 %603  ;;  %v3251_v58 = vrot.slane %v412_v6, %v2977_v29 }
  0xa0   : > { %v428_v25 = vcombine.high %v403_v18, %v419_v17  ;;  %v427_v63 = vcombine.low %v403_v18, %v419_v17  ;;  %v3277_v18 = vrot.slane %v396_v34, %v2977_v29 }
  0xa2   : > { %v3224_v4 = vrot.slane %v428_v25, %v3193_v26  ;;  %v511_v25 = vcombine.low %v3230_v2, %v3227_v40  ;;  %v3281_v57 = vrot.slane %v427_v63, %v3193_v26  ;;  %v3300_v63 = vrot.slane %v250_v56, %v3193_v26 }
  0xa3   : > { %v616_v23 = vpop.permute.xlu1 %615  ;;  %v612_v24 = vpop.permute.xlu0 %611  ;;  %v443_v31 = vcombine.low %v3277_v18, %v3251_v58 }
  0xa4   : > { %v709_v43 = vcombine.low %v608_v51, %v616_v23  ;;  %v693_v44 = vcombine.low %v604_v22, %v612_v24  ;;  %v2466_v19 = vpack.i.bf16 %v3221_v3, %v3224_v4  ;;  %v694_v6 = vcombine.high %v604_v22, %v612_v24  ;;  %4349 = vst [vmem:[#allocation9_spill] sm:$0xff] %v3281_v57 }
  0xa5   : > { %4350 = vst [vmem:[#allocation10_spill] sm:$0xff] %v3300_v63  ;;  %v459_v56 = vcombine.high %v3281_v57, %v4328_v13 }
  0xa6   : > { %v717_v20 = vrot.slane %v709_v43, %v2977_v29  ;;  %v701_v52 = vrot.slane %v693_v44, %v2977_v29  ;;  %2467 = vrot.lane.b32.xlu0 %v2466_v19, %s2834_s28  ;;  %v265_v43 = vrot.slane %v251_v53, %v3193_v26  ;;  %v3258_v19 = vrot.slane %v511_v25, %v3193_v26 }
  0xa7   : > { %v3239_v21 = vpop.permute.xlu1 %605  ;;  %v3241_v5 = vpop.permute.xlu0 %601  ;;  %v3270_v53 = vrot.slane %v871_v55, %v3193_v26  ;;  %v3306_v24 = vrot.slane %v694_v6, %v2977_v29 }
  0xa8   : > { %v726_v0 = vcombine.high %v701_v52, %v717_v20  ;;  %v725_v25 = vcombine.low %v701_v52, %v717_v20  ;;  %v3314_v52 = vrot.slane %v183_v1, %v3193_v26  ;;  %v2476_v32 = vpack.i.bf16 %v3264_v33, %v3258_v19 }
  0xa9   : > { %4348 = vst [vmem:[#allocation8_spill] sm:$0xff] %v3270_v53  ;;  %v903_v22 = vcombine.high %v3270_v53, %v4328_v13  ;;  %4352 = vst [vmem:[#allocation12_spill] sm:$0xff] %v3306_v24  ;;  %v3348_v53 = vrot.slane %v443_v31, %v3193_v26  ;;  %v495_v31 = vcombine.low %v3196_v27, %v3199_v28 }
  0xaa   : > { %v3248_v44 = vrot.slane %v726_v0, %v3193_v26  ;;  %v710_v0 = vcombine.high %v608_v51, %v616_v23  ;;  %v3323_v34 = vrot.slane %v725_v25, %v3193_v26  ;;  %v4354_v25 = vcombine.low %v3043_v50, %v3033_v48 }
  0xab   : > { %v3253_v30 = vpop.permute.xlu1 %613  ;;  %v3255_v38 = vpop.permute.xlu0 %609  ;;  %v4356_v28 = vcombine.high %v3017_v42, %v3014_v41 }
  0xac   : > { %v641_v39 = vcombine.low %v3239_v21, %v3253_v30  ;;  %v625_v17 = vcombine.low %v3241_v5, %v3255_v38  ;;  %v2471_v54 = vpack.i.bf16 %v3248_v44, %v265_v43  ;;  %v3303_v23 = vrot.slane %v710_v0, %v2977_v29  ;;  %4353 = vst [vmem:[#allocation13_spill] sm:$0xff] %v3323_v34 }
  0xad   : > { %v757_v57 = vcombine.high %v3323_v34, %v4328_v13 }
  0xae   : > { %v3284_v47 = vrot.slane %v641_v39, %v2977_v29  ;;  %v3287_v49 = vrot.slane %v625_v17, %v2977_v29  ;;  %2472 = vrot.lane.b32.xlu1 %v2471_v54, %s2834_s28  ;;  %4351 = vst [vmem:[#allocation11_spill] sm:$0xff] %v3303_v23  ;;  %v741_v39 = vcombine.low %v3306_v24, %v3303_v23 }
  0xaf   : > { %v3290_v55 = vpop.permute.xlu1 %1289  ;;  %v3292_v51 = vpop.permute.xlu0 %1285  ;;  %v282_v17 = vcombine.high %v3300_v63, %v4328_v13  ;;  %v3341_v54 = vrot.slane %v4354_v25, %v3193_v26 }
  0xb0   : > { %v658_v20 = vcombine.high %v3287_v49, %v3284_v47  ;;  %v3371_v34 = vrot.slane %v741_v39, %v3193_v26  ;;  %v657_v41 = vcombine.low %v3287_v49, %v3284_v47 }
  0xb1   : > { %v2511_v23 = vpack.i.bf16 %v757_v57, %v282_v17  ;;  %v4357_v57 = vcombine.low %v3001_v36, %v2998_v35  ;;  %v758_v36 = vcombine.high %v3248_v44, %v4328_v13 }
  0xb2   : > { %v3326_v0 = vrot.slane %v658_v20, %v3193_v26  ;;  %2477 = vrot.lane.b32.xlu1 %v2476_v32, %s2835_s29  ;;  %v2506_v20 = vpack.i.bf16 %v903_v22, %v459_v56  ;;  %v972_v22 = vcombine.high %v3207_v37, %v4328_v13  ;;  %v4355_v56 = vcombine.low %v3024_v45, %v3027_v46 }
  0xb3   : > { %v3329_v1 = vpop.permute.xlu1 %1297  ;;  %v3331_v6 = vpop.permute.xlu0 %1293  ;;  %v2486_v37 = vpack.i.bf16 %v3341_v54, %v3348_v53  ;;  %v3443_v46 = vrot.slane %v657_v41, %v3193_v26 }
  0xb4   : > { %v2481_v32 = vpack.i.bf16 %v3326_v0, %v3314_v52  ;;  %v3362_v25 = vrot.slane %v4355_v56, %v3193_v26 }
  0xb5   : > { %4362 = vst [vmem:[#allocation17_spill] sm:$0xff] %v3443_v46 }
  0xb6   : > { %2507 = vrot.lane.b32.xlu1 %v2506_v20, %s2836_s30  ;;  %2482 = vrot.lane.b32.xlu0 %v2481_v32, %s2834_s28  ;;  %v512_v20 = vcombine.high %v3230_v2, %v3227_v40  ;;  %v528_v32 = vcombine.high %v3210_v15, %v4328_v13  ;;  %v283_v2 = vcombine.high %v265_v43, %v4328_v13 }
  0xb7   : > { %v3352_v63 = vpop.permute.xlu1 %1741  ;;  %v3354_v24 = vpop.permute.xlu0 %1737  ;;  %v3386_v15 = vrot.slane %v4356_v28, %v3193_v26  ;;  %v3392_v40 = vrot.slane %v4357_v57, %v3193_v26  ;;  %v2491_v39 = vpack.i.bf16 %v3371_v34, %v3362_v25  ;;  %v3400_v43 = vrot.slane %v495_v31, %v3193_v26 }
  0xb8   : > { %v3397_v17 = vrot.slane %v512_v20, %v3193_v26  ;;  %v1391_v20 = vcombine.low %v3290_v55, %v3329_v1  ;;  %v1375_v31 = vcombine.low %v3292_v51, %v3331_v6  ;;  %v4360_v28 = vcombine.low %v3065_v60, %v3062_v59 }
  0xb9   : > { %4358 = vst [vmem:[#allocation14_spill] sm:$0xff] %v3392_v40  ;;  %4359 = vst [vmem:[#allocation15_spill] sm:$0xff] %v3400_v43  ;;  %v971_v44 = vcombine.high %v3392_v40, %v4328_v13  ;;  %v2531_v40 = vpack.i.bf16 %v758_v36, %v283_v2 }
  0xba   : > { %2512 = vrot.lane.b32.xlu1 %v2511_v23, %s2836_s30  ;;  %2487 = vrot.lane.b32.xlu0 %v2486_v37, %s2835_s29  ;;  %v2516_v23 = vpack.i.bf16 %v972_v22, %v528_v32  ;;  %v973_v22 = vcombine.high %v3264_v33, %v4328_v13  ;;  %v2496_v33 = vpack.i.bf16 %v3386_v15, %v3397_v17 }
  0xbb   : > { %v3377_v56 = vpop.permute.xlu1 %1749  ;;  %v3379_v27 = vpop.permute.xlu0 %1745  ;;  %v529_v32 = vcombine.high %v3258_v19, %v4328_v13  ;;  %v527_v37 = vcombine.high %v3400_v43, %v4328_v13  ;;  %v3434_v57 = vrot.slane %v4360_v28, %v3193_v26  ;;  %v3446_v19 = vrot.slane %v1391_v20, %v2977_v29 }
  0xbc   : > { %v1843_v42 = vcombine.low %v3352_v63, %v3377_v56  ;;  %v1827_v35 = vcombine.low %v3354_v24, %v3379_v27  ;;  %v3449_v13 = vrot.slane %v1375_v31, %v2977_v29 }
  0xbd   : > { %4361 = vst [vmem:[#allocation16_spill] sm:$0xff] %v3434_v57  ;;  %v2536_v41 = vpack.i.bf16 %v973_v22, %v529_v32 }
  0xbe   : > { %2517 = vrot.lane.b32.xlu1 %v2516_v23, %s2837_s3  ;;  %2492 = vrot.lane.b32.xlu0 %v2491_v39, %s2835_s29  ;;  %v3437_v23 = vrot.slane %v1843_v42, %v2977_v29  ;;  %v3440_v39 = vrot.slane %v1827_v35, %v2977_v29  ;;  %v4363_v42 = vmov 0.0   ;;  %v2501_v35 = vpack.i.bf16 %v971_v44, %v527_v37 }
  0xbf   : > { %v3418_v47 = vpop.permute.xlu1 %1287  ;;  %v3420_v49 = vpop.permute.xlu0 %1283  ;;  %v215_v2 = vcombine.high %v3314_v52, %v4363_v42  ;;  %v690_v36 = vcombine.high %v3326_v0, %v4363_v42  ;;  %v214_v20 = vcombine.high %v3434_v57, %v4363_v42  ;;  %v689_v52 = vcombine.high %v3443_v46, %v4363_v42 }
  0xc0   : > { %v1407_v22 = vcombine.low %v3449_v13, %v3446_v19  ;;  %v905_v32 = vcombine.high %v3341_v54, %v4363_v42  ;;  %v461_v28 = vcombine.high %v3348_v53, %v4363_v42  ;;  %v460_v57 = vcombine.high %v3224_v4, %v4363_v42 }
  0xc1   : > { %v2551_v37 = vpack.i.bf16 %v690_v36, %v215_v2  ;;  %v904_v46 = vcombine.high %v3221_v3, %v4363_v42  ;;  %v2521_v54 = vpack.i.bf16 %v689_v52, %v214_v20  ;;  %v642_v2 = vcombine.high %v3239_v21, %v3253_v30 }
  0xc2   : > { %2532 = vrot.lane.b32.xlu1 %v2531_v40, %s2837_s3  ;;  %2497 = vrot.lane.b32.xlu0 %v2496_v33, %s2838_s4  ;;  %v1859_v40 = vcombine.low %v3440_v39, %v3437_v23  ;;  %v626_v53 = vcombine.high %v3241_v5, %v3255_v38  ;;  %v3507_v36 = vrot.slane %v1407_v22, %v3193_v26 }
  0xc3   : > { %v3453_v59 = vpop.permute.xlu1 %1295  ;;  %v3455_v60 = vpop.permute.xlu0 %1291  ;;  %v1605_v20 = vcombine.low %v3113_v7, %v3123_v9  ;;  %v2556_v30 = vpack.i.bf16 %v905_v32, %v461_v28  ;;  %v1860_v38 = vcombine.high %v3440_v39, %v3437_v23  ;;  %v1589_v52 = vcombine.low %v3116_v8, %v3126_v10 }
  0xc4   : > { %v1323_v31 = vcombine.low %v3418_v47, %v3453_v59  ;;  %v1307_v33 = vcombine.low %v3420_v49, %v3455_v60  ;;  %4365 = vst [vmem:[#allocation19_spill] sm:$0xff] %v3507_v36  ;;  %v3524_v22 = vrot.slane %v642_v2, %v2977_v29  ;;  %v3529_v28 = vrot.slane %v626_v53, %v2977_v29 }
  0xc5   : > { %v1408_v23 = vcombine.high %v3449_v13, %v3446_v19  ;;  %v1439_v39 = vcombine.high %v3507_v36, %v4363_v42  ;;  %v3548_v13 = vrot.slane %v1605_v20, %v2977_v29  ;;  %v3551_v19 = vrot.slane %v1589_v52, %v2977_v29 }
  0xc6   : > { %2537 = vrot.lane.b32.xlu1 %v2536_v41, %s2839_s5  ;;  %2502 = vrot.lane.b32.xlu0 %v2501_v35, %s2836_s30  ;;  %v3488_v41 = vrot.slane %v1859_v40, %v3193_v26  ;;  %v3491_v35 = vrot.slane %v1323_v31, %v2977_v29  ;;  %v3494_v43 = vrot.slane %v1307_v33, %v2977_v29 }
  0xc7   : > { %v3475_v0 = vpop.permute.xlu1 %1739  ;;  %v3477_v44 = vpop.permute.xlu0 %1735  ;;  %v2526_v31 = vpack.i.bf16 %v904_v46, %v460_v57  ;;  %v284_v52 = vcombine.high %v3362_v25, %v4363_v42  ;;  %v444_v36 = vcombine.high %v3277_v18, %v3251_v58  ;;  %v4371_v58 = vcombine.low %v3074_v62, %v3071_v61 }
  0xc8   : > { %4364 = vst [vmem:[#allocation18_spill] sm:$0xff] %v3488_v41  ;;  %v1339_v40 = vcombine.low %v3494_v43, %v3491_v35  ;;  %v1891_v33 = vcombine.high %v3488_v41, %v4363_v42 }
  0xc9   : > { %v206_v18 = vrot.slane %v4371_v58, %v3193_v26  ;;  %v1521_v58 = vcombine.low %v3144_v12, %v3154_v16 }
  0xca   : > { %2552 = vrot.lane.b32.xlu1 %v2551_v37, %s2837_s3  ;;  %2522 = vrot.lane.b32.xlu0 %v2521_v54, %s2836_s30  ;;  %v3542_v2 = vrot.slane %v1339_v40, %v3193_v26  ;;  %v2541_v53 = vpack.i.bf16 %v1891_v33, %v1439_v39 }
  0xcb   : > { %v3502_v4 = vpop.permute.xlu1 %1747  ;;  %v3504_v3 = vpop.permute.xlu0 %1743 }
  0xcc   : > { %v1775_v21 = vcombine.low %v3475_v0, %v3502_v4  ;;  %v1759_v5 = vcombine.low %v3477_v44, %v3504_v3  ;;  %4368 = vst [vmem:[#allocation22_spill] sm:$0xff] %v3542_v2 }
  0xce   : > { %v1783_v37 = vrot.slane %v1775_v21, %v2977_v29  ;;  %v1767_v32 = vrot.slane %v1759_v5, %v2977_v29  ;;  %2557 = vrot.lane.b32.xlu1 %v2556_v30, %s2839_s5  ;;  %2527 = vrot.lane.b32.xlu0 %v2526_v31, %s2837_s3  ;;  %v3545_v21 = vrot.slane %v1860_v38, %v3193_v26 }
  0xcf   : > { %v3535_v46 = vpop.permute.xlu1 %1059  ;;  %v3537_v57 = vpop.permute.xlu0 %1055  ;;  %v673_v30 = vcombine.low %v3529_v28, %v3524_v22  ;;  %v3564_v38 = vrot.slane %v1408_v23, %v3193_v26  ;;  %v759_v23 = vcombine.high %v3371_v34, %v4363_v42 }
  0xd0   : > { %4366 = vst [vmem:[#allocation20_spill] sm:$0xff] %v3535_v46  ;;  %4367 = vst [vmem:[#allocation21_spill] sm:$0xff] %v3537_v57  ;;  %v1791_v54 = vcombine.low %v1767_v32, %v1783_v37 }
  0xd1   : > { %v2546_v39 = vpack.i.bf16 %v3545_v21, %v3564_v38  ;;  %v681_v34 = vrot.slane %v673_v30, %v3193_v26  ;;  %v458_v30 = vrot.slane %v444_v36, %v3193_v26 }
  0xd2   : > { %v3554_v5 = vrot.slane %v1791_v54, %v3193_v26  ;;  %2542 = vrot.lane.b32.xlu0 %v2541_v53, %s2836_s30  ;;  %v1371_v54 = vcombine.high %v3542_v2, %v4363_v42 }
  0xd3   : > { %v3559_v40 = vpop.permute.xlu1 %1067  ;;  %v3561_v31 = vpop.permute.xlu0 %1063 }
  0xd4   : > { %4369 = vst [vmem:[#allocation23_spill] sm:$0xff] %v3554_v5  ;;  %4370 = vst [vmem:[#allocation24_spill] sm:$0xff] %v3561_v31  ;;  %v1161_v20 = vcombine.low %v3535_v46, %v3559_v40  ;;  %v1145_v33 = vcombine.low %v3537_v57, %v3561_v31  ;;  %v1823_v53 = vcombine.high %v3554_v5, %v4363_v42 }
  0xd5   : > { %v1621_v57 = vcombine.low %v3551_v19, %v3548_v13  ;;  %v1792_v46 = vcombine.high %v1767_v32, %v1783_v37  ;;  %v1340_v32 = vcombine.high %v3494_v43, %v3491_v35 }
  0xd6   : > { %v3583_v41 = vrot.slane %v1161_v20, %v2977_v29  ;;  %v3586_v25 = vrot.slane %v1145_v33, %v2977_v29  ;;  %2547 = vrot.lane.b32.xlu0 %v2546_v39, %s2834_s28  ;;  %v2561_v2 = vpack.i.bf16 %v1823_v53, %v1371_v54  ;;  %v1537_v20 = vcombine.low %v3141_v11, %v3151_v14 }
  0xd7   : > { %v3591_v31 = vpop.permute.xlu1 %1057  ;;  %v3593_v5 = vpop.permute.xlu0 %1053  ;;  %v2571_v39 = vpack.i.bf16 %v759_v23, %v284_v52  ;;  %v530_v54 = vcombine.high %v3397_v17, %v4363_v42  ;;  %v974_v53 = vcombine.high %v3386_v15, %v4363_v42  ;;  %v4372_v11 = vcombine.high %v3043_v50, %v3033_v48 }
  0xd8   : > { %v1177_v33 = vcombine.low %v3586_v25, %v3583_v41  ;;  %2562 = vrot.lane.b32.xlu1 %v2561_v2, %s2836_s30  ;;  %v3617_v37 = vrot.slane %v1621_v57, %v3193_v26  ;;  %v2566_v15 = vpack.i.bf16 %v681_v34, %v206_v18  ;;  %v1806_v43 = vrot.slane %v1792_v46, %v3193_v26 }
  0xd9   : > { %v902_v14 = vrot.slane %v4372_v11, %v3193_v26  ;;  %v2581_v11 = vpack.i.bf16 %v974_v53, %v530_v54  ;;  %v3636_v35 = vrot.slane %v1537_v20, %v2977_v29  ;;  %v3639_v57 = vrot.slane %v1521_v58, %v2977_v29 }
  0xda   : > { %v3622_v17 = vrot.slane %v1177_v33, %v3193_v26  ;;  %2572 = vrot.lane.b32.xlu0 %v2571_v39, %s2839_s5  ;;  %v1653_v23 = vcombine.high %v3617_v37, %v4363_v42  ;;  %v1354_v46 = vrot.slane %v1340_v32, %v3193_v26  ;;  %v216_v54 = vcombine.high %v206_v18, %v4363_v42 }
  0xdb   : > { %v3625_v2 = vpop.permute.xlu1 %1065  ;;  %v3627_v36 = vpop.permute.xlu0 %1061  ;;  %v2576_v52 = vpack.i.bf16 %v902_v14, %v458_v30  ;;  %v691_v53 = vcombine.high %v681_v34, %v4363_v42  ;;  %v1844_v58 = vcombine.high %v3352_v63, %v3377_v56  ;;  %v1376_v32 = vcombine.high %v3292_v51, %v3331_v6  ;;  %v4375_v34 = vld [vmem:[#allocation12_spill] sm:$0xff] }
  0xdc   : > { %4373 = vst [vmem:[#allocation25_spill] sm:$0xff] %v3622_v17  ;;  %v1093_v48 = vcombine.low %v3591_v31, %v3625_v2  ;;  %v1077_v50 = vcombine.low %v3593_v5, %v3627_v36  ;;  %2567 = vrot.lane.b32.xlu1 %v2566_v15, %s2835_s29  ;;  %v1209_v20 = vcombine.high %v3622_v17, %v4363_v42 }
  0xdd   : > { %v1828_v15 = vcombine.high %v3354_v24, %v3379_v27  ;;  %v1553_v18 = vcombine.low %v3639_v57, %v3636_v35  ;;  %v1892_v56 = vcombine.high %v3545_v21, %v4363_v42  ;;  %v2601_v27 = vpack.i.bf16 %v691_v53, %v216_v54 }
  0xde   : > { %2582 = vrot.lane.b32.xlu0 %v2581_v11, %s2840_s6  ;;  %v3645_v33 = vrot.slane %v1093_v48, %v2977_v29  ;;  %v3648_v39 = vrot.slane %v1077_v50, %v2977_v29  ;;  %v2591_v48 = vpack.i.bf16 %v1806_v43, %v1354_v46  ;;  %v1392_v50 = vcombine.high %v3290_v55, %v3329_v1  ;;  %v4374_v11 = vld [vmem:[#allocation11_spill] sm:$0xff] }
  0xdf   : > { %v742_v17 = vcombine.high %v4375_v34, %v4374_v11  ;;  %v2586_v24 = vpack.i.bf16 %v1653_v23, %v1209_v20  ;;  %v462_v55 = vcombine.high %v458_v30, %v4363_v42  ;;  %v906_v51 = vcombine.high %v902_v14, %v4363_v42 }
  0xe0   : > { %2577 = vrot.lane.b32.xlu1 %v2576_v52, %s2838_s4  ;;  %v1109_v63 = vcombine.low %v3648_v39, %v3645_v33  ;;  %v1622_v1 = vcombine.high %v3551_v19, %v3548_v13  ;;  %v3678_v6 = vrot.slane %v1844_v58, %v2977_v29  ;;  %v3681_v52 = vrot.slane %v1828_v15, %v2977_v29  ;;  %v4376_v13 = vld [vmem:[#allocation5_spill] sm:$0xff] }
  0xe1   : > { %v1178_v23 = vcombine.high %v3586_v25, %v3583_v41  ;;  %v1440_v21 = vcombine.high %v3564_v38, %v4363_v42  ;;  %v3689_v30 = vrot.slane %v1392_v50, %v2977_v29  ;;  %v3692_v14 = vrot.slane %v1376_v32, %v2977_v29 }
  0xe2   : > { %2592 = vrot.lane.b32.xlu0 %v2591_v48, %s2834_s28  ;;  %v4377_v19 = vcombine.high %v3024_v45, %v4376_v13  ;;  %v3699_v54 = vrot.slane %v1109_v63, %v3193_v26  ;;  %v756_v25 = vrot.slane %v742_v17, %v3193_v26  ;;  %v3704_v38 = vrot.slane %v1553_v18, %v3193_v26 }
  0xe3   : > { %v2596_v41 = vpack.i.bf16 %v1892_v56, %v1440_v21  ;;  %v1875_v53 = vcombine.low %v3681_v52, %v3678_v6  ;;  %v2611_v58 = vpack.i.bf16 %v906_v51, %v462_v55  ;;  %v1192_v45 = vrot.slane %v1178_v23, %v3193_v26 }
  0xe4   : > { %2587 = vrot.lane.b32.xlu1 %v2586_v24, %s2836_s30  ;;  %v281_v20 = vrot.slane %v4377_v19, %v3193_v26  ;;  %v1636_v15 = vrot.slane %v1622_v1, %v3193_v26  ;;  %v1423_v48 = vcombine.low %v3692_v14, %v3689_v30  ;;  %v1141_v17 = vcombine.high %v3699_v54, %v4363_v42 }
  0xe5   : > { %v1585_v32 = vcombine.high %v3704_v38, %v4363_v42  ;;  %v1883_v11 = vrot.slane %v1875_v53, %v3193_v26  ;;  %v674_v34 = vcombine.high %v3529_v28, %v3524_v22  ;;  %v1776_v24 = vcombine.high %v3475_v0, %v3502_v4  ;;  %v4381_v53 = vld [vmem:[#allocation21_spill] sm:$0xff] }
  0xe6   : > { %2602 = vrot.lane.b32.xlu0 %v2601_v27, %s2839_s5  ;;  %v2606_v50 = vpack.i.bf16 %v756_v25, %v281_v20  ;;  %v2621_v18 = vpack.i.bf16 %v1636_v15, %v1192_v45  ;;  %v1431_v63 = vrot.slane %v1423_v48, %v3193_v26  ;;  %v1760_v56 = vcombine.high %v3477_v44, %v3504_v3 }
  0xe7   : > { %v2616_v27 = vpack.i.bf16 %v1585_v32, %v1141_v17  ;;  %v1824_v55 = vcombine.high %v1806_v43, %v4363_v42  ;;  %v285_v51 = vcombine.high %v281_v20, %v4363_v42  ;;  %v760_v1 = vcombine.high %v756_v25, %v4363_v42  ;;  %v4379_v20 = vld [vmem:[#allocation20_spill] sm:$0xff] }
  0xe8   : > { %2597 = vrot.lane.b32.xlu1 %v2596_v41, %s2837_s3  ;;  %v1324_v22 = vcombine.high %v3418_v47, %v3453_v59  ;;  %v1308_v28 = vcombine.high %v3420_v49, %v3455_v60  ;;  %v2631_v0 = vpack.i.bf16 %v1883_v11, %v1431_v63  ;;  %v1372_v44 = vcombine.high %v1354_v46, %v4363_v42  ;;  %v4380_v25 = vld [vmem:[#allocation24_spill] sm:$0xff] }
  0xe9   : > { %v4378_v4 = vcombine.high %v3074_v62, %v3071_v61  ;;  %v688_v43 = vrot.slane %v674_v34, %v3193_v26  ;;  %v1554_v23 = vcombine.high %v3639_v57, %v3636_v35  ;;  %v3745_v47 = vrot.slane %v1776_v24, %v2977_v29 }
  0xea   : > { %2612 = vrot.lane.b32.xlu0 %v2611_v58, %s2840_s6  ;;  %v3748_v49 = vrot.slane %v1760_v56, %v2977_v29  ;;  %v1110_v59 = vcombine.high %v3648_v39, %v3645_v33  ;;  %v2626_v60 = vpack.i.bf16 %v1824_v55, %v1372_v44  ;;  %v1654_v61 = vcombine.high %v1636_v15, %v4363_v42 }
  0xeb   : > { %v213_v3 = vrot.slane %v4378_v4, %v3193_v26  ;;  %v3755_v62 = vrot.slane %v1324_v22, %v2977_v29  ;;  %v3758_v46 = vrot.slane %v1308_v28, %v2977_v29  ;;  %v2641_v35 = vpack.i.bf16 %v760_v1, %v285_v51  ;;  %v3820_v1 = vpop.permute.xlu1 %1971  ;;  %v3827_v4 = vpop.permute.xlu0 %1967 }
  0xec   : > { %2607 = vrot.lane.b32.xlu1 %v2606_v50, %s2838_s4  ;;  %v1210_v57 = vcombine.high %v1192_v45, %v4363_v42  ;;  %v1606_v21 = vcombine.high %v3113_v7, %v3123_v9  ;;  %v1590_v33 = vcombine.high %v3116_v8, %v3126_v10  ;;  %v1568_v13 = vrot.slane %v1554_v23, %v3193_v26  ;;  %v4382_v7 = vld [vmem:[#allocation7_spill] sm:$0xff]  ;;  %v4383_v9 = vld [vmem:[#allocation6_spill] sm:$0xff] }
  0xed   : > { %v2636_v39 = vpack.i.bf16 %v688_v43, %v213_v3  ;;  %v1807_v19 = vcombine.low %v3748_v49, %v3745_v47  ;;  %v1162_v41 = vcombine.high %v4379_v20, %v3559_v40  ;;  %v1146_v58 = vcombine.high %v4381_v53, %v4380_v25 }
  0xee   : > { %2622 = vrot.lane.b32.xlu0 %v2621_v18, %s2834_s28  ;;  %v1124_v45 = vrot.slane %v1110_v59, %v3193_v26  ;;  %v1538_v15 = vcombine.high %v4383_v9, %v4382_v7  ;;  %v1522_v8 = vcombine.high %v3144_v12, %v3154_v16  ;;  %v1893_v10 = vcombine.high %v1883_v11, %v4363_v42 }
  0xef   : > { %v1355_v48 = vcombine.low %v3758_v46, %v3755_v62  ;;  %v1094_v40 = vcombine.high %v3591_v31, %v3625_v2  ;;  %v1078_v50 = vcombine.high %v3593_v5, %v3627_v36  ;;  %v2651_v17 = vpack.i.bf16 %v1654_v61, %v1210_v57 }
  0xf0   : > { %2617 = vrot.lane.b32.xlu1 %v2616_v27, %s2836_s30  ;;  %v3788_v32 = vrot.slane %v1606_v21, %v2977_v29  ;;  %v3791_v18 = vrot.slane %v1590_v33, %v2977_v29  ;;  %v1441_v12 = vcombine.high %v1431_v63, %v4363_v42  ;;  %v3795_v16 = vrot.slane %v1162_v41, %v2977_v29  ;;  %v3852_v41 = vpop.permute.xlu0 %1975 }
  0xf1   : > { %v3798_v11 = vrot.slane %v1146_v58, %v2977_v29  ;;  %v2646_v5 = vpack.i.bf16 %v1568_v13, %v1124_v45  ;;  %v1815_v31 = vrot.slane %v1807_v19, %v3193_v26  ;;  %v3803_v2 = vrot.slane %v1538_v15, %v2977_v29 }
  0xf2   : > { %2632 = vrot.lane.b32.xlu0 %v2631_v0, %s2835_s29  ;;  %v3806_v36 = vrot.slane %v1522_v8, %v2977_v29  ;;  %v2661_v34 = vpack.i.bf16 %v1893_v10, %v1441_v12  ;;  %v1586_v63 = vcombine.high %v1568_v13, %v4363_v42  ;;  %v3810_v24 = vrot.slane %v1094_v40, %v2977_v29 }
  0xf3   : > { %v3813_v56 = vrot.slane %v1078_v50, %v2977_v29  ;;  %v1363_v27 = vrot.slane %v1355_v48, %v3193_v26  ;;  %v1142_v55 = vcombine.high %v1124_v45, %v4363_v42  ;;  %v1637_v51 = vcombine.low %v3791_v18, %v3788_v32 }
  0xf4   : > { %2627 = vrot.lane.b32.xlu1 %v2626_v60, %s2837_s3  ;;  %v1193_v22 = vcombine.low %v3798_v11, %v3795_v16  ;;  %v217_v0 = vcombine.high %v213_v3, %v4363_v42  ;;  %v692_v44 = vcombine.high %v688_v43, %v4363_v42  ;;  %v1825_v60 = vcombine.high %v1815_v31, %v4363_v42  ;;  %v3865_v7 = vpop.permute.xlu0 %1965 }
  0xf5   : > { %v2656_v28 = vpack.i.bf16 %v1815_v31, %v1363_v27  ;;  %v1125_v23 = vcombine.low %v3813_v56, %v3810_v24  ;;  %v2671_v59 = vpack.i.bf16 %v1586_v63, %v1142_v55  ;;  %v1569_v61 = vcombine.low %v3806_v36, %v3803_v2 }
  0xf6   : > { %2642 = vrot.lane.b32.xlu0 %v2641_v35, %s2840_s6  ;;  %v1645_v35 = vrot.slane %v1637_v51, %v3193_v26  ;;  %v1876_v3 = vcombine.high %v3681_v52, %v3678_v6  ;;  %v2666_v43 = vpack.i.bf16 %v692_v44, %v217_v0  ;;  %v1373_v57 = vcombine.high %v1363_v27, %v4363_v42 }
  0xf7   : > { %v1201_v21 = vrot.slane %v1193_v22, %v3193_v26  ;;  %v1808_v33 = vcombine.high %v3748_v49, %v3745_v47  ;;  %v1424_v13 = vcombine.high %v3692_v14, %v3689_v30  ;;  %v1133_v6 = vrot.slane %v1125_v23, %v3193_v26 }
  0xf8   : > { %2637 = vrot.lane.b32.xlu1 %v2636_v39, %s2838_s4  ;;  %v3843_v39 = vpop.permute.xlu1 %1979  ;;  %v2681_v19 = vpack.i.bf16 %v1825_v60, %v1373_v57  ;;  %v1577_v52 = vrot.slane %v1569_v61, %v3193_v26  ;;  %v1356_v20 = vcombine.high %v3758_v46, %v3755_v62  ;;  %v1890_v49 = vrot.slane %v1876_v3, %v3193_v26  ;;  %v1974_v27 = vpop.permute.xlu0 %1973 }
  0xf9   : > { %v2676_v47 = vpack.i.bf16 %v1645_v35, %v1201_v21  ;;  %v1822_v25 = vrot.slane %v1808_v33, %v3193_v26  ;;  %v1438_v14 = vrot.slane %v1424_v13, %v3193_v26  ;;  %v1211_v46 = vcombine.high %v1201_v21, %v4363_v42 }
  0xfa   : > { %2652 = vrot.lane.b32.xlu0 %v2651_v17, %s2837_s3  ;;  %v2691_v30 = vpack.i.bf16 %v1577_v52, %v1133_v6  ;;  %v1370_v53 = vrot.slane %v1356_v20, %v3193_v26  ;;  %v1655_v45 = vcombine.high %v1645_v35, %v4363_v42  ;;  %v1587_v9 = vcombine.high %v1577_v52, %v4363_v42 }
  0xfb   : > { %v2686_v62 = vpack.i.bf16 %v1890_v49, %v1438_v14  ;;  %v1638_v8 = vcombine.high %v3791_v18, %v3788_v32  ;;  %v1194_v10 = vcombine.high %v3798_v11, %v3795_v16  ;;  %v2057_v48 = vcombine.low %v3827_v4, %v3852_v41 }
  0xfc   : > { %2647 = vrot.lane.b32.xlu1 %v2646_v5, %s2834_s28  ;;  %v3860_v58 = vpop.permute.xlu1 %1969  ;;  %v2701_v15 = vpack.i.bf16 %v1822_v25, %v1370_v53  ;;  %v1143_v40 = vcombine.high %v1133_v6, %v4363_v42  ;;  %v2073_v50 = vcombine.low %v3820_v1, %v3843_v39  ;;  %v1894_v17 = vcombine.high %v1890_v49, %v4363_v42 }
  0xfd   : > { %v2696_v12 = vpack.i.bf16 %v1655_v45, %v1211_v46  ;;  %v1826_v32 = vcombine.high %v1822_v25, %v4363_v42  ;;  %v1442_v18 = vcombine.high %v1438_v14, %v4363_v42  ;;  %v1652_v11 = vrot.slane %v1638_v8, %v3193_v26 }
  0xfe   : > { %2662 = vrot.lane.b32.xlu0 %v2661_v34, %s2839_s5  ;;  %v1208_v5 = vrot.slane %v1194_v10, %v3193_v26  ;;  %v2065_v31 = vrot.slane %v2057_v48, %v2977_v29  ;;  %v2081_v34 = vrot.slane %v2073_v50, %v2977_v29  ;;  %v2711_v63 = vpack.i.bf16 %v1587_v9, %v1143_v40 }
  0xff   : > { %v2706_v55 = vpack.i.bf16 %v1894_v17, %v1442_v18  ;;  %v1570_v51 = vcombine.high %v3806_v36, %v3803_v2  ;;  %v1126_v22 = vcombine.high %v3813_v56, %v3810_v24  ;;  %v1374_v0 = vcombine.high %v1370_v53, %v4363_v42 }
 0x100   : > { %2657 = vrot.lane.b32.xlu1 %v2656_v28, %s2835_s29  ;;  %v1978_v16 = vpop.permute.xlu1 %1977  ;;  %v1989_v28 = vcombine.low %v3865_v7, %v1974_v27  ;;  %v2089_v23 = vcombine.low %v2065_v31, %v2081_v34  ;;  %v1212_v60 = vcombine.high %v1208_v5, %v4363_v42  ;;  %v1656_v61 = vcombine.high %v1652_v11, %v4363_v42 }
 0x101   : > { %v2005_v44 = vcombine.low %v3860_v58, %v1978_v16  ;;  %v1584_v2 = vrot.slane %v1570_v51, %v3193_v26  ;;  %v1140_v36 = vrot.slane %v1126_v22, %v3193_v26  ;;  %v2716_v35 = vpack.i.bf16 %v1652_v11, %v1208_v5  ;;  %v4385_v5 = vld [vmem:[#allocation9_spill] sm:$0xff] }
 0x102   : > { %2672 = vrot.lane.b32.xlu0 %v2671_v59, %s2837_s3  ;;  %v2721_v59 = vpack.i.bf16 %v1826_v32, %v1374_v0  ;;  %v1997_v24 = vrot.slane %v1989_v28, %v2977_v29  ;;  %v3904_v3 = vrot.slane %v2089_v23, %v3193_v26  ;;  %v2074_v6 = vcombine.high %v3820_v1, %v3843_v39 }
 0x103   : > { %v2013_v56 = vrot.slane %v2005_v44, %v2977_v29  ;;  %v2726_v21 = vpack.i.bf16 %v1584_v2, %v1140_v36  ;;  %v1144_v33 = vcombine.high %v1140_v36, %v4363_v42  ;;  %v1588_v13 = vcombine.high %v1584_v2, %v4363_v42 }
 0x104   : > { %2667 = vrot.lane.b32.xlu1 %v2666_v43, %s2840_s6  ;;  %v2731_v43 = vpack.i.bf16 %v1656_v61, %v1212_v60  ;;  %v2090_v52 = vcombine.high %v2065_v31, %v2081_v34  ;;  %v2121_v20 = vcombine.high %v3904_v3, %v4363_v42  ;;  %v1990_v39 = vcombine.high %v3865_v7, %v1974_v27 }
 0x105   : > { %v2021_v57 = vcombine.low %v1997_v24, %v2013_v56  ;;  %v2736_v49 = vpack.i.bf16 %v1588_v13, %v1144_v33  ;;  %v2006_v14 = vcombine.high %v3860_v58, %v1978_v16  ;;  %v2022_v53 = vcombine.high %v1997_v24, %v2013_v56  ;;  %v4384_v16 = vld [vmem:[#allocation8_spill] sm:$0xff] }
 0x106   : > { %2682 = vrot.lane.b32.xlu0 %v2681_v19, %s2839_s5  ;;  %v2058_v19 = vcombine.high %v3827_v4, %v3852_v41  ;;  %v2104_v1 = vrot.slane %v2090_v52, %v3193_v26  ;;  %v2004_v8 = vrot.slane %v1990_v39, %v2977_v29 }
 0x107   : > { %v2020_v7 = vrot.slane %v2006_v14, %v2977_v29  ;;  %v2036_v58 = vrot.slane %v2022_v53, %v3193_v26 }
 0x108   : > { %2677 = vrot.lane.b32.xlu1 %v2676_v47, %s2835_s29  ;;  %v3918_v47 = vrot.slane %v2021_v57, %v3193_v26  ;;  %v2072_v25 = vrot.slane %v2058_v19, %v2977_v29 }
 0x10a   : > { %2692 = vrot.lane.b32.xlu0 %v2691_v30, %s2835_s29  ;;  %v2088_v30 = vrot.slane %v2074_v6, %v2977_v29  ;;  %v2054_v29 = vcombine.high %v2036_v58, %v4363_v42 }
 0x10c   : > { %2687 = vrot.lane.b32.xlu1 %v2686_v62, %s2838_s4  ;;  %v2053_v62 = vcombine.high %v3918_v47, %v4363_v42  ;;  %v2105_v46 = vcombine.low %v2072_v25, %v2088_v30  ;;  %v2106_v34 = vcombine.high %v2072_v25, %v2088_v30 }
 0x10e   : > { %2702 = vrot.lane.b32.xlu0 %v2701_v15, %s2838_s4  ;;  %v2122_v15 = vcombine.high %v2104_v1, %v4363_v42  ;;  %v2113_v40 = vrot.slane %v2105_v46, %v3193_v26  ;;  %v2120_v23 = vrot.slane %v2106_v34, %v3193_v26 }
 0x110   : > { %2697 = vrot.lane.b32.xlu1 %v2696_v12, %s2839_s5  ;;  %v3923_v4 = vpop.permute.xlu0 %2462  ;;  %v2037_v12 = vcombine.low %v2004_v8, %v2020_v7  ;;  %v2124_v36 = vcombine.high %v2120_v23, %v4363_v42 }
 0x112   : > { %2712 = vrot.lane.b32.xlu0 %v2711_v63, %s2839_s5  ;;  %v2045_v28 = vrot.slane %v2037_v12, %v3193_v26  ;;  %v2464_v12 = vunpack.i.l.bf16 %v3923_v4 }
 0x114   : > { %2707 = vrot.lane.b32.xlu1 %v2706_v55, %s2840_s6  ;;  %v2123_v55 = vcombine.high %v2113_v40, %v4363_v42  ;;  %v2055_v60 = vcombine.high %v2045_v28, %v4363_v42 }
 0x116   : > { %2722 = vrot.lane.b32.xlu0 %v2721_v59, %s2840_s6  ;;  %v2038_v59 = vcombine.high %v2004_v8, %v2020_v7 }
 0x118   : > { %2717 = vrot.lane.b32.xlu1 %v2716_v35, %s2838_s4  ;;  %v2468_v45 = vpop.permute.xlu0 %2467  ;;  %v2052_v24 = vrot.slane %v2038_v59, %v3193_v26 }
 0x119   : > { %v2470_v32 = vunpack.i.h.bf16 %v2468_v45  ;;  %v2469_v18 = vunpack.i.l.bf16 %v2468_v45 }
 0x11a   : > { %2732 = vrot.lane.b32.xlu0 %v2731_v43, %s2840_s6  ;;  %v2056_v43 = vcombine.high %v2052_v24, %v4363_v42 }
 0x11c   : > { %2727 = vrot.lane.b32.xlu1 %v2726_v21, %s2838_s4 }
 0x11e   : > { %2154 = vrot.lane.b32.xlu0 %v2121_v20, %s2836_s30 }
 0x120   : > { %v3925_v41 = vpop.permute.xlu1 %2472  ;;  %2737 = vrot.lane.b32.xlu1 %v2736_v49, %s2840_s6 }
 0x122   : > { %2158 = vrot.lane.b32.xlu0 %v2104_v1, %s2834_s28 }
 0x124   : > { %v3934_v9 = vpop.permute.xlu1 %2477  ;;  %2126 = vrot.lane.b32.xlu1 %v2053_v62, %s2836_s30 }
 0x126   : > { %2162 = vrot.lane.b32.xlu0 %v2122_v15, %s2837_s3 }
 0x128   : > { %v2508_v10 = vpop.permute.xlu1 %2507  ;;  %v3942_v48 = vpop.permute.xlu0 %2482  ;;  %2130 = vrot.lane.b32.xlu1 %v2036_v58, %s2834_s28  ;;  %v4386_v58 = vld [vmem:[#allocation14_spill] sm:$0xff]  ;;  %s2769_s28 = sshll.u32 %s2841_s13, 4  ;;  %s2770_s28 = int_to_ptr.vmem [resolvable:$false] %s2769_s28 }
 0x129   : > { %v2510_v50 = vunpack.i.h.bf16 %v2508_v10  ;;  %v2509_v17 = vunpack.i.l.bf16 %v2508_v10  ;;  %p2772_p0 = scmp.lt.s32.totalorder %s4272_s21, %s2770_s28 }
 0x12a   : > { %2166 = vrot.lane.b32.xlu0 %v2113_v40, %s2835_s29  ;;  %v4387_v40 = vld [vmem:[#allocation15_spill] sm:$0xff] }
 0x12b   : > { %v1031_v11 = vsel %vm342_vm0, %v4384_v16, %v2510_v50  ;;  %v587_v31 = vsel %vm342_vm0, %v4385_v5, %v2509_v17  ;;  %v2465_v17 = vunpack.i.h.bf16 %v3923_v4 }
 0x12c   : > { %v3952_v63 = vpop.permute.xlu1 %2512  ;;  %v2488_v27 = vpop.permute.xlu0 %2487  ;;  %2134 = vrot.lane.b32.xlu1 %v2054_v29, %s2837_s3  ;;  %v588_v51 = vsel %vm344_vm1, %v587_v31, %v2469_v18  ;;  %v1032_v22 = vsel %vm344_vm1, %v1031_v11, %v2470_v32 }
 0x12d   : > { %v2490_v6 = vunpack.i.h.bf16 %v2488_v27  ;;  %v2489_v52 = vunpack.i.l.bf16 %v2488_v27  ;;  %v2515_v11 = vunpack.i.h.bf16 %v3952_v63  ;;  %v2514_v5 = vunpack.i.l.bf16 %v3952_v63 }
 0x12e   : > { %2170 = vrot.lane.b32.xlu0 %v2123_v55, %s2839_s5 }
 0x130   : > { %v2518_v0 = vpop.permute.xlu1 %2517  ;;  %v3960_v44 = vpop.permute.xlu0 %2492  ;;  %2138 = vrot.lane.b32.xlu1 %v2045_v28, %s2835_s29  ;;  %s2771_s29 = scalar_lea.vmem %s2770_s28, 512 }
 0x131   : > { %v2520_v31 = vunpack.i.h.bf16 %v2518_v0  ;;  %v2519_v34 = vunpack.i.l.bf16 %v2518_v0  ;;  %v2475_v0 = vunpack.i.h.bf16 %v3925_v41  ;;  %p2773_p1 = scmp.lt.s32.totalorder %s2771_s29, %s2765_s27 }
 0x132   : > { %2174 = vrot.lane.b32.xlu0 %v2120_v23, %s2838_s4  ;;  %v4388_v23 = vld [vmem:[#allocation13_spill] sm:$0xff] }
 0x133   : > { %v824_v59 = vsel %vm342_vm0, %v4388_v23, %v2515_v11  ;;  %p2774_p2 = por %p2773_p1, %p2772_p0 }
 0x134   : > { %v3966_v61 = vpop.permute.xlu1 %2532  ;;  %v3968_v2 = vpop.permute.xlu0 %2497  ;;  %2142 = vrot.lane.b32.xlu1 %v2055_v60, %s2839_s5  ;;  %v4389_v60 = vld [vmem:[#allocation10_spill] sm:$0xff] }
 0x135   : > { %v356_v63 = vsel %vm342_vm0, %v4389_v60, %v2514_v5  ;;  %p2775_p3 = pnand %p2774_p2, %p2768_p13 }
 0x136   : > { %2178 = vrot.lane.b32.xlu0 %v2124_v36, %s2840_s6  ;;  %v2474_v36 = vunpack.i.l.bf16 %v3925_v41 }
 0x138   : > { %v2503_v56 = vpop.permute.xlu0 %2502  ;;  %2146 = vrot.lane.b32.xlu1 %v2052_v24, %s2838_s4  ;;  %v3975_v35 = vpop.permute.xlu1 %2537  ;;  %v357_v41 = vsel %vm344_vm1, %v356_v63, %v2474_v36 }
 0x139   : > { %v2505_v45 = vunpack.i.h.bf16 %v2503_v56  ;;  %v2504_v15 = vunpack.i.l.bf16 %v2503_v56 }
 0x13b   : > { %v1038_v10 = vsel %vm342_vm0, %v4386_v58, %v2505_v45  ;;  %v594_v50 = vsel %vm342_vm0, %v4387_v40, %v2504_v15 }
 0x13c   : > { %2150 = vrot.lane.b32.xlu1 %v2056_v43, %s2840_s6  ;;  %v3979_v57 = vpop.permute.xlu0 %2522  ;;  %v3981_v21 = vpop.permute.xlu1 %2552  ;;  %v1039_v18 = vsel %vm344_vm1, %v1038_v10, %v2465_v17  ;;  %v595_v29 = vsel %vm344_vm1, %v594_v50, %v2464_v12  ;;  %v2535_v43 = vunpack.i.h.bf16 %v3966_v61  ;;  %v2499_v10 = vunpack.i.l.bf16 %v3968_v2 }
 0x13d   : > { %v1040_v55 = vsel %vm346_vm2, %v1039_v18, %v2520_v31  ;;  %v596_v4 = vsel %vm346_vm2, %v595_v29, %v2519_v34  ;;  %v2524_v40 = vunpack.i.l.bf16 %v3979_v57 }
 0x140   : > { %v2528_v33 = vpop.permute.xlu0 %2527  ;;  %v3993_v30 = vpop.permute.xlu1 %2557 }
 0x141   : > { %v2530_v13 = vunpack.i.h.bf16 %v2528_v33  ;;  %v2529_v19 = vunpack.i.l.bf16 %v2528_v33  ;;  %v2534_v33 = vunpack.i.l.bf16 %v3966_v61 }
 0x143   : > { %v1033_v26 = vsel %vm346_vm2, %v1032_v22, %v2530_v13  ;;  %v589_v20 = vsel %vm346_vm2, %v588_v51, %v2529_v19  ;;  %v2480_v51 = vunpack.i.h.bf16 %v3934_v9  ;;  %v2479_v22 = vunpack.i.l.bf16 %v3934_v9 }
 0x144   : > { %v3985_v49 = vpop.permute.xlu0 %2542  ;;  %v3988_v42 = vsel %vm348_vm3, %v1033_v26, %v2490_v6  ;;  %v3991_v25 = vsel %vm348_vm3, %v589_v20, %v2489_v52  ;;  %v2540_v13 = vunpack.i.h.bf16 %v3975_v35  ;;  %v2539_v19 = vunpack.i.l.bf16 %v3975_v35 }
 0x145   : > { %v597_v56 = vsel %vm348_vm3, %v596_v4, %v2479_v22  ;;  %v1041_v9 = vsel %vm348_vm3, %v1040_v55, %v2480_v51  ;;  %v2495_v6 = vunpack.i.h.bf16 %v3960_v44  ;;  %v2494_v52 = vunpack.i.l.bf16 %v3960_v44  ;;  %v4390_v4 = vld [vmem:[#allocation17_spill] sm:$0xff]  ;;  %v4391_v22 = vld [vmem:[#allocation16_spill] sm:$0xff] }
 0x146   : > { %v825_v26 = vsel %vm344_vm1, %v824_v59, %v2475_v0  ;;  %v598_v61 = vsel %vm350_vm4, %v597_v56, %v2539_v19  ;;  %v1042_v58 = vsel %vm350_vm4, %v1041_v9, %v2540_v13  ;;  %v2500_v35 = vunpack.i.h.bf16 %v3968_v2 }
 0x147   : > { %v2525_v44 = vunpack.i.h.bf16 %v3979_v57  ;;  %v358_v17 = vsel %vm346_vm2, %v357_v41, %v2534_v33  ;;  %v826_v12 = vsel %vm346_vm2, %v825_v26, %v2535_v43  ;;  %v599_v2 = vsel %vm352_vm5, %v598_v61, %v2499_v10 }
 0x148   : > { %v3995_v1 = vpop.permute.xlu0 %2547  ;;  %v1043_v31 = vsel %vm352_vm5, %v1042_v58, %v2500_v35  ;;  %v2484_v57 = vunpack.i.l.bf16 %v3942_v48  ;;  %v827_v23 = vsel %vm348_vm3, %v826_v12, %v2495_v6  ;;  %v2485_v19 = vunpack.i.h.bf16 %v3942_v48 }
 0x149   : > { %v817_v51 = vsel %vm342_vm0, %v4390_v4, %v2525_v44  ;;  %v2555_v61 = vunpack.i.h.bf16 %v3981_v21  ;;  %v2554_v58 = vunpack.i.l.bf16 %v3981_v21  ;;  %v2559_v48 = vunpack.i.l.bf16 %v3993_v30 }
 0x14a   : > { %v3997_v39 = vpop.permute.xlu1 %2562  ;;  %v818_v35 = vsel %vm344_vm1, %v817_v51, %v2485_v19  ;;  %v2545_v10 = vunpack.i.h.bf16 %v3985_v49  ;;  %v2544_v44 = vunpack.i.l.bf16 %v3985_v49  ;;  %v2560_v12 = vunpack.i.h.bf16 %v3993_v30  ;;  %v4393_v51 = vld [vmem:[#allocation19_spill] sm:$0xff] }
 0x14c   : > { %v3999_v14 = vpop.permute.xlu0 %2572  ;;  %v1035_v30 = vsel %vm350_vm4, %v3988_v42, %v2560_v12 }
 0x14d   : > { %v2574_v18 = vunpack.i.l.bf16 %v3999_v14 }
 0x14e   : > { %v4001_v53 = vpop.permute.xlu1 %2567 }
 0x150   : > { %v4003_v62 = vpop.permute.xlu0 %2582 }
 0x151   : > { %v2585_v45 = vunpack.i.h.bf16 %v4003_v62  ;;  %v2584_v15 = vunpack.i.l.bf16 %v4003_v62  ;;  %v2575_v62 = vunpack.i.h.bf16 %v3999_v14  ;;  %v343_v14 = vsel %vm342_vm0, %v4391_v22, %v2524_v40 }
 0x152   : > { %v4005_v46 = vpop.permute.xlu1 %2577  ;;  %v345_v41 = vsel %vm344_vm1, %v343_v14, %v2484_v57  ;;  %v2569_v22 = vunpack.i.l.bf16 %v4001_v53 }
 0x153   : > { %v600_v34 = vsel %vm354_vm6, %v599_v2, %v2584_v15  ;;  %v1044_v55 = vsel %vm354_vm6, %v1043_v31, %v2585_v45  ;;  %v828_v60 = vsel %vm350_vm4, %v827_v23, %v2575_v62  ;;  %v2549_v62 = vunpack.i.l.bf16 %v3995_v1 }
 0x154   : > { %v4007_v8 = vpop.permute.xlu0 %2592  ;;  %v2198_v33 = vrot.slane %v600_v34, 4  ;;  %v2204_v13 = vrot.slane %v1044_v55, 4  ;;  %v2580_v21 = vunpack.i.h.bf16 %v4005_v46  ;;  %v591_v2 = vsel %vm350_vm4, %v3991_v25, %v2559_v48  ;;  %v4392_v55 = vld [vmem:[#allocation18_spill] sm:$0xff] }
 0x155   : > { %v2565_v31 = vunpack.i.h.bf16 %v3997_v39  ;;  %v1958_v4 = vsel %vm342_vm0, %v4392_v55, %v2545_v10  ;;  %v2570_v25 = vunpack.i.h.bf16 %v4001_v53  ;;  %v4394_v53 = vld [vmem:[#allocation23_spill] sm:$0xff]  ;;  %v2595_v19 = vunpack.i.h.bf16 %v4007_v8 }
 0x156   : > { %v4009_v7 = vpop.permute.xlu1 %2587 }
 0x157   : > { %v2590_v10 = vunpack.i.h.bf16 %v4009_v7 }
 0x158   : > { %v4017_v32 = vpop.permute.xlu0 %2602 }
 0x159   : > { %v2605_v23 = vunpack.i.h.bf16 %v4017_v32 }
 0x15a   : > { %v4021_v16 = vpop.permute.xlu1 %2597 }
 0x15b   : > { %v2600_v12 = vunpack.i.h.bf16 %v4021_v16 }
 0x15c   : > { %v4025_v27 = vpop.permute.xlu0 %2612 }
 0x15d   : > { %v2615_v57 = vunpack.i.h.bf16 %v4025_v27  ;;  %v2614_v34 = vunpack.i.l.bf16 %v4025_v27  ;;  %v2604_v27 = vunpack.i.l.bf16 %v4017_v32 }
 0x15e   : > { %v2608_v28 = vpop.permute.xlu1 %2607 }
 0x15f   : > { %v2610_v29 = vunpack.i.h.bf16 %v2608_v28  ;;  %v2609_v11 = vunpack.i.l.bf16 %v2608_v28  ;;  %v359_v28 = vsel %vm348_vm3, %v358_v17, %v2494_v52 }
 0x160   : > { %v4037_v24 = vpop.permute.xlu0 %2622  ;;  %v360_v63 = vsel %vm350_vm4, %v359_v28, %v2574_v18  ;;  %v347_v18 = vsel %vm346_vm2, %v345_v41, %v2554_v58  ;;  %v2550_v28 = vunpack.i.h.bf16 %v3995_v1  ;;  %v2564_v1 = vunpack.i.l.bf16 %v3997_v39 }
 0x161   : > { %v361_v9 = vsel %vm352_vm5, %v360_v63, %v2609_v11  ;;  %v829_v43 = vsel %vm352_vm5, %v828_v60, %v2610_v29  ;;  %v819_v29 = vsel %vm346_vm2, %v818_v35, %v2555_v61  ;;  %v2579_v11 = vunpack.i.l.bf16 %v4005_v46 }
 0x162   : > { %v4049_v20 = vpop.permute.xlu1 %2617  ;;  %v1506_v46 = vsel %vm342_vm0, %v4393_v51, %v2544_v44  ;;  %v1036_v60 = vsel %vm352_vm5, %v1035_v30, %v2580_v21  ;;  %v349_v32 = vsel %vm348_vm3, %v347_v18, %v2569_v22  ;;  %v2589_v44 = vunpack.i.l.bf16 %v4009_v7 }
 0x163   : > { %v1507_v42 = vsel %vm344_vm1, %v1506_v46, %v2549_v62  ;;  %v2599_v62 = vunpack.i.l.bf16 %v4021_v16  ;;  %v2625_v30 = vunpack.i.h.bf16 %v4037_v24  ;;  %v2620_v16 = vunpack.i.h.bf16 %v4049_v20 }
 0x164   : > { %v4059_v50 = vpop.permute.xlu0 %2632  ;;  %v1720_v46 = vsel %vm342_vm0, %v3617_v37, %v2590_v10  ;;  %v2619_v22 = vunpack.i.l.bf16 %v4049_v20 }
 0x166   : > { %v4065_v5 = vpop.permute.xlu1 %2627 }
 0x167   : > { %v2630_v37 = vunpack.i.h.bf16 %v4065_v5 }
 0x168   : > { %v2643_v59 = vpop.permute.xlu0 %2642 }
 0x169   : > { %v2645_v0 = vunpack.i.h.bf16 %v2643_v59  ;;  %v2644_v36 = vunpack.i.l.bf16 %v2643_v59  ;;  %v592_v59 = vsel %vm352_vm5, %v591_v2, %v2579_v11  ;;  %v1959_v11 = vsel %vm344_vm1, %v1958_v4, %v2550_v28  ;;  %v4395_v2 = vld [vmem:[#allocation22_spill] sm:$0xff]  ;;  %v4396_v4 = vld [vmem:[#allocation25_spill] sm:$0xff] }
 0x16a   : > { %v4080_v56 = vpop.permute.xlu1 %2637  ;;  %v2634_v28 = vunpack.i.l.bf16 %v4059_v50 }
 0x16b   : > { %v362_v52 = vsel %vm354_vm6, %v361_v9, %v2644_v36  ;;  %v830_v6 = vsel %vm354_vm6, %v829_v43, %v2645_v0  ;;  %v2640_v63 = vunpack.i.h.bf16 %v4080_v56  ;;  %v2639_v0 = vunpack.i.l.bf16 %v4080_v56 }
 0x16c   : > { %v4088_v26 = vpop.permute.xlu0 %2652  ;;  %v2221_v45 = vsel %vm2219_vm7, %v362_v52, %v2198_v33  ;;  %v2223_v15 = vsel %vm2219_vm7, %v830_v6, %v2204_v13  ;;  %v1951_v9 = vsel %vm342_vm0, %v4394_v53, %v2565_v31  ;;  %v593_v43 = vsel %vm354_vm6, %v592_v59, %v2614_v34 }
 0x16d   : > { %v2401_v17 = vpack.c.bf16 %v2223_v15, %v2221_v45  ;;  %v1037_v33 = vsel %vm354_vm6, %v1036_v60, %v2615_v57  ;;  %v820_v13 = vsel %vm348_vm3, %v819_v29, %v2570_v25  ;;  %v2594_v52 = vunpack.i.l.bf16 %v4007_v8 }
 0x16e   : > { %v4098_v40 = vpop.permute.xlu1 %2647  ;;  %v351_v6 = vsel %vm350_vm4, %v349_v32, %v2604_v27  ;;  %v821_v41 = vsel %vm350_vm4, %v820_v13, %v2605_v23  ;;  %v2197_v39 = vrot.slane %v593_v43, 4  ;;  %v2203_v61 = vrot.slane %v1037_v33, 4 }
 0x16f   : > { %2402 = vmatprep.subr.bf16.mxu0 %v2401_v17  ;;  %v353_v58 = vsel %vm352_vm5, %v351_v6, %v2639_v0  ;;  %v822_v35 = vsel %vm352_vm5, %v821_v41, %v2640_v63  ;;  %v1499_v31 = vsel %vm342_vm0, %v4395_v2, %v2564_v1  ;;  %v1952_v7 = vsel %vm344_vm1, %v1951_v9, %v2595_v19 }
 0x170   : > { %v4108_v49 = vpop.permute.xlu0 %2662  ;;  %v1500_v57 = vsel %vm344_vm1, %v1499_v31, %v2594_v52  ;;  %v2624_v34 = vunpack.i.l.bf16 %v4037_v24  ;;  %v1276_v25 = vsel %vm342_vm0, %v4396_v4, %v2589_v44  ;;  %v1508_v23 = vsel %vm346_vm2, %v1507_v42, %v2599_v62 }
 0x171   : > { %v1960_v27 = vsel %vm346_vm2, %v1959_v11, %v2600_v12  ;;  %v2635_v24 = vunpack.i.h.bf16 %v4059_v50  ;;  %v2629_v59 = vunpack.i.l.bf16 %v4065_v5  ;;  %v1721_v63 = vsel %vm344_vm1, %v1720_v46, %v2625_v30 }
 0x172   : > { %v4121_v14 = vpop.permute.xlu1 %2657  ;;  %v2655_v0 = vunpack.i.h.bf16 %v4088_v26  ;;  %v2654_v20 = vunpack.i.l.bf16 %v4088_v26  ;;  %v1277_v53 = vsel %vm344_vm1, %v1276_v25, %v2624_v34  ;;  %v1713_v42 = vsel %vm342_vm0, %v3704_v38, %v2620_v16 }
 0x173   : > { %v2650_v9 = vunpack.i.h.bf16 %v4098_v40  ;;  %v2649_v50 = vunpack.i.l.bf16 %v4098_v40  ;;  %v1269_v43 = vsel %vm342_vm0, %v3699_v54, %v2619_v22  ;;  %v1509_v33 = vsel %vm348_vm3, %v1508_v23, %v2634_v28 }
 0x174   : > { %v4131_v36 = vpop.permute.xlu0 %2672  ;;  %v2665_v5 = vunpack.i.h.bf16 %v4108_v49  ;;  %v2664_v32 = vunpack.i.l.bf16 %v4108_v49  ;;  %v1961_v26 = vsel %vm348_vm3, %v1960_v27, %v2635_v24  ;;  %v1501_v13 = vsel %vm346_vm2, %v1500_v57, %v2629_v59 }
 0x175   : > { %v2660_v38 = vunpack.i.h.bf16 %v4121_v14  ;;  %v2659_v19 = vunpack.i.l.bf16 %v4121_v14  ;;  %v1953_v40 = vsel %vm346_vm2, %v1952_v7, %v2630_v37  ;;  %v1722_v54 = vsel %vm346_vm2, %v1721_v63, %v2655_v0 }
 0x176   : > { %v2668_v56 = vpop.permute.xlu1 %2667  ;;  %v2675_v6 = vunpack.i.h.bf16 %v4131_v36  ;;  %v1270_v41 = vsel %vm344_vm1, %v1269_v43, %v2649_v50  ;;  %v1714_v49 = vsel %vm344_vm1, %v1713_v42, %v2650_v9  ;;  %v1510_v14 = vsel %vm350_vm4, %v1509_v33, %v2664_v32 }
 0x177   : > { %v2670_v45 = vunpack.i.h.bf16 %v2668_v56  ;;  %v2669_v15 = vunpack.i.l.bf16 %v2668_v56  ;;  %v1278_v56 = vsel %vm346_vm2, %v1277_v53, %v2654_v20  ;;  %v1502_v10 = vsel %vm348_vm3, %v1501_v13, %v2659_v19 }
 0x178   : > { %v4146_v48 = vpop.permute.xlu0 %2682  ;;  %v1954_v44 = vsel %vm348_vm3, %v1953_v40, %v2660_v38  ;;  %v1715_v62 = vsel %vm346_vm2, %v1714_v49, %v2675_v6 }
 0x179   : > { %v355_v8 = vsel %vm354_vm6, %v353_v58, %v2669_v15  ;;  %v823_v17 = vsel %vm354_vm6, %v822_v35, %v2670_v45  ;;  %v2685_v45 = vunpack.i.h.bf16 %v4146_v48  ;;  %v2684_v15 = vunpack.i.l.bf16 %v4146_v48 }
 0x17a   : > { %v4154_v18 = vpop.permute.xlu1 %2677  ;;  %v2220_v29 = vsel %vm2219_vm7, %v355_v8, %v2197_v39  ;;  %v2222_v21 = vsel %vm2219_vm7, %v823_v17, %v2203_v61  ;;  %v1962_v61 = vsel %vm350_vm4, %v1961_v26, %v2665_v5  ;;  %v2674_v48 = vunpack.i.l.bf16 %v4131_v36 }
 0x17b   : > { %v2403_v51 = vpack.c.bf16 %v2222_v21, %v2220_v29  ;;  %v2680_v58 = vunpack.i.h.bf16 %v4154_v18  ;;  %v2679_v35 = vunpack.i.l.bf16 %v4154_v18  ;;  %v1503_v11 = vsel %vm350_vm4, %v1502_v10, %v2684_v15 }
 0x17c   : > { %v4166_v55 = vpop.permute.xlu0 %2692  ;;  %v1955_v2 = vsel %vm350_vm4, %v1954_v44, %v2685_v45 }
 0x17d   : > { %2404 = vmatpush1.bf16.msra.mxu0 %v2403_v51  ;;  %v1279_v30 = vsel %vm348_vm3, %v1278_v56, %v2679_v35  ;;  %v1723_v57 = vsel %vm348_vm3, %v1722_v54, %v2680_v58  ;;  %v2695_v34 = vunpack.i.h.bf16 %v4166_v55  ;;  %v2694_v16 = vunpack.i.l.bf16 %v4166_v55 }
 0x17e   : > { %v2688_v60 = vpop.permute.xlu1 %2687  ;;  %v1271_v56 = vsel %vm346_vm2, %v1270_v41, %v2674_v48 }
 0x17f   : > { %v2690_v8 = vunpack.i.h.bf16 %v2688_v60  ;;  %v2689_v17 = vunpack.i.l.bf16 %v2688_v60  ;;  %v1272_v45 = vsel %vm348_vm3, %v1271_v56, %v2694_v16  ;;  %v1716_v15 = vsel %vm348_vm3, %v1715_v62, %v2695_v34 }
 0x180   : > { %v2703_v1 = vpop.permute.xlu0 %2702 }
 0x181   : > { %v1511_v51 = vsel %vm352_vm5, %v1510_v14, %v2689_v17  ;;  %v1963_v36 = vsel %vm352_vm5, %v1962_v61, %v2690_v8  ;;  %v2705_v46 = vunpack.i.h.bf16 %v2703_v1  ;;  %v2704_v4 = vunpack.i.l.bf16 %v2703_v1 }
 0x182   : > { %v2698_v52 = vpop.permute.xlu1 %2697 }
 0x183   : > { %v2700_v31 = vunpack.i.h.bf16 %v2698_v52  ;;  %v2699_v7 = vunpack.i.l.bf16 %v2698_v52  ;;  %v1504_v42 = vsel %vm352_vm5, %v1503_v11, %v2704_v4  ;;  %v1956_v9 = vsel %vm352_vm5, %v1955_v2, %v2705_v46 }
 0x184   : > { %v4204_v39 = vpop.permute.xlu0 %2712 }
 0x185   : > { %v1280_v24 = vsel %vm350_vm4, %v1279_v30, %v2699_v7  ;;  %v1724_v59 = vsel %vm350_vm4, %v1723_v57, %v2700_v31  ;;  %v2715_v33 = vunpack.i.h.bf16 %v4204_v39  ;;  %v2714_v5 = vunpack.i.l.bf16 %v4204_v39 }
 0x186   : > { %v2708_v12 = vpop.permute.xlu1 %2707 }
 0x187   : > { %v2710_v29 = vunpack.i.h.bf16 %v2708_v12  ;;  %v2709_v21 = vunpack.i.l.bf16 %v2708_v12  ;;  %v1273_v14 = vsel %vm350_vm4, %v1272_v45, %v2714_v5  ;;  %v1717_v61 = vsel %vm350_vm4, %v1716_v15, %v2715_v33 }
 0x188   : > { %v2723_v18 = vpop.permute.xlu0 %2722 }
 0x189   : > { %v1512_v22 = vsel %vm354_vm6, %v1511_v51, %v2709_v21  ;;  %v1964_v28 = vsel %vm354_vm6, %v1963_v36, %v2710_v29  ;;  %v2725_v60 = vunpack.i.h.bf16 %v2723_v18  ;;  %v2724_v63 = vunpack.i.l.bf16 %v2723_v18 }
 0x18a   : > { %v2718_v25 = vpop.permute.xlu1 %2717  ;;  %v2210_v50 = vrot.slane %v1512_v22, 4  ;;  %v2216_v1 = vrot.slane %v1964_v28, 4 }
 0x18b   : > { %v2720_v23 = vunpack.i.h.bf16 %v2718_v25  ;;  %v2719_v27 = vunpack.i.l.bf16 %v2718_v25  ;;  %v1505_v54 = vsel %vm354_vm6, %v1504_v42, %v2724_v63  ;;  %v1957_v6 = vsel %vm354_vm6, %v1956_v9, %v2725_v60 }
 0x18c   : > { %v2733_v55 = vpop.permute.xlu0 %2732  ;;  %v2209_v10 = vrot.slane %v1505_v54, 4  ;;  %v2215_v44 = vrot.slane %v1957_v6, 4 }
 0x18d   : > { %v1281_v37 = vsel %vm352_vm5, %v1280_v24, %v2719_v27  ;;  %v1725_v0 = vsel %vm352_vm5, %v1724_v59, %v2720_v23  ;;  %v2735_v20 = vunpack.i.h.bf16 %v2733_v55  ;;  %v2734_v53 = vunpack.i.l.bf16 %v2733_v55 }
 0x18e   : > { %v2728_v43 = vpop.permute.xlu1 %2727 }
 0x18f   : > { %v1282_v32 = vsel %vm354_vm6, %v1281_v37, %v2734_v53  ;;  %v1726_v26 = vsel %vm354_vm6, %v1725_v0, %v2735_v20  ;;  %v2730_v13 = vunpack.i.h.bf16 %v2728_v43  ;;  %v2729_v38 = vunpack.i.l.bf16 %v2728_v43 }
 0x190   : > { %v2155_v19 = vpop.permute.xlu0 %2154  ;;  %v2225_v52 = vsel %vm2219_vm7, %v1282_v32, %v2210_v50  ;;  %v2227_v40 = vsel %vm2219_vm7, %v1726_v26, %v2216_v1 }
 0x191   : > { %v2405_v49 = vpack.c.bf16 %v2227_v40, %v2225_v52  ;;  %v1274_v41 = vsel %vm352_vm5, %v1273_v14, %v2729_v38  ;;  %v1718_v8 = vsel %vm352_vm5, %v1717_v61, %v2730_v13  ;;  %v2188_v34 = vsel %vm342_vm0, %v3904_v3, %v2155_v19 }
 0x192   : > { %v2738_v39 = vpop.permute.xlu1 %2737 }
 0x193   : > { %v2740_v58 = vunpack.i.h.bf16 %v2738_v39  ;;  %v2739_v35 = vunpack.i.l.bf16 %v2738_v39  ;;  %2406 = vmatprep.subr.bf16.mxu0 %v2405_v49 }
 0x194   : > { %v2159_v17 = vpop.permute.xlu0 %2158 }
 0x195   : > { %v1275_v12 = vsel %vm354_vm6, %v1274_v41, %v2739_v35  ;;  %v1719_v48 = vsel %vm354_vm6, %v1718_v8, %v2740_v58  ;;  %v2189_v16 = vsel %vm344_vm1, %v2188_v34, %v2159_v17 }
 0x196   : > { %v2127_v62 = vpop.permute.xlu1 %2126  ;;  %v2224_v29 = vsel %vm2219_vm7, %v1275_v12, %v2209_v10  ;;  %v2226_v21 = vsel %vm2219_vm7, %v1719_v48, %v2215_v44 }
 0x197   : > { %v2407_v11 = vpack.c.bf16 %v2226_v21, %v2224_v29  ;;  %v2181_v23 = vsel %vm342_vm0, %v3918_v47, %v2127_v62  ;;  %v2228_v47 = vld [vmem:[%s4318_s1] sm:$0xff] }
 0x198   : > { %v2163_v2 = vpop.permute.xlu0 %2162 }
 0x199   : > { %2408 = vmatpush1.bf16.msra.mxu0 %v2407_v11  ;;  %v2190_v36 = vsel %vm346_vm2, %v2189_v16, %v2163_v2 }
 0x19a   : > { %v2131_v31 = vpop.permute.xlu1 %2130 }
 0x19b   : > { %v2182_v3 = vsel %vm344_vm1, %v2181_v23, %v2131_v31 }
 0x19c   : > { %v2167_v7 = vpop.permute.xlu0 %2166 }
 0x19d   : > { %v2191_v46 = vsel %vm348_vm3, %v2190_v36, %v2167_v7 }
 0x19e   : > { %v2135_v18 = vpop.permute.xlu1 %2134 }
 0x19f   : > { %v2183_v59 = vsel %vm346_vm2, %v2182_v3, %v2135_v18 }
 0x1a0   : > { %v2171_v30 = vpop.permute.xlu0 %2170 }
 0x1a1   : > { %v2192_v25 = vsel %vm350_vm4, %v2191_v46, %v2171_v30 }
 0x1a2   : > { %v2139_v57 = vpop.permute.xlu1 %2138 }
 0x1a3   : > { %v2184_v60 = vsel %vm348_vm3, %v2183_v59, %v2139_v57 }
 0x1a4   : > { %v2175_v51 = vpop.permute.xlu0 %2174 }
 0x1a5   : > { %v2193_v22 = vsel %vm352_vm5, %v2192_v25, %v2175_v51 }
 0x1a6   : > { %v2143_v4 = vpop.permute.xlu1 %2142 }
 0x1a7   : > { %v2185_v63 = vsel %vm350_vm4, %v2184_v60, %v2143_v4 }
 0x1a8   : > { %v2179_v28 = vpop.permute.xlu0 %2178 }
 0x1a9   : > { %v2194_v27 = vsel %vm354_vm6, %v2193_v22, %v2179_v28 }
 0x1aa   : > { %v2147_v24 = vpop.permute.xlu1 %2146  ;;  %2392 = vmatprep.subr.msk.mxu0 %vm2219_vm7, %v2194_v27 }
 0x1ab   : > { %v2186_v55 = vsel %vm352_vm5, %v2185_v63, %v2147_v24 }
 0x1ae   : > { %v2151_v37 = vpop.permute.xlu1 %2150 }
 0x1af   : > { %v2187_v0 = vsel %vm354_vm6, %v2186_v55, %v2151_v37 }
 0x1b0   : > { %2393 = vmatpush1.msk.msra.mxu0 %vm2219_vm7, %v2187_v0 }
 0x1b1   : > { %2394 = vmatmul.mubr.msk.f32.vlgmr.msra.gmra.mrb[0].mxu0 %vm2229_vm8, %v2228_v47 }
 0x284   : > { %v2305_v20 = vpop.f32.mrb[0].mxu0 }
 0x285   : > { %2310 = vst [vmem:[%s136_s17] sm:$0xff] %v2305_v20  ;;  %v2307_v53 = vpop.f32.mrb[1].mxu0 }
 0x286   : > { %2311 = vst [vmem:[%s136_s17 + $0x8] sm:$0xff] %v2307_v53 }
 0x287   : > { %2778 = shalt.err (!%p2775_p3)
}
 0x288   : > { %s2779_s30 = scalar_lea.hbm %s4277_s25, 256  ;;  %s2783_s5 = scalar_lea.hbm %s4319_s2, 512 }
 0x289   : > { %p2780_p4 = scmp.ne.s32.totalorder %s4277_s25, %s2779_s30  ;;  %p2784_p9 = scmp.lt.u32.totalorder %s4277_s25, %s4319_s2 }
 0x28a   : > { %p2785_p10 = scmp.lt.u32.totalorder %s2783_s5, %s2779_s30  ;;  %p2787_p12 = scmp.lt.u32.totalorder %s2779_s30, %s4277_s25 }
 0x28b   : > { %p2781_p7 = pnand %p2780_p4, %p2895_p5 }
 0x28c   : > { %p2786_p11 = por %p2785_p10, %p2784_p9 }
 0x28d   : > { %p2782_p8 = pneg %p2781_p7 }
 0x28e   : > { %p2788_p13 = por %p2787_p12, %p2786_p11 }
 0x290   : > { %p2789_p0 = pnand %p2788_p13, %p2782_p8 }
 0x292   : > { %2792 = shalt.err (!%p2789_p0)
}
 0x293   : > { %2410 = dma.vmem_to_hbm [thread:$0]  (%p2895_p5), %s4272_s21, 256, %s4277_s25, %s2313_s26  }
 0x294 PF: > { %p2416_p1 = scmp.ge.s32.totalorder %s2827_s12, 2  ;;  %s2339_s8 = sand.u32 1, %s2815_s9  }
 0x295   : > { %s2340_s14 = scalar_lea.sflag [#allocation3], %s2339_s8 }
 0x296   : > { %p2413_p2 = pnand %p2416_p1, %p2899_p6 }
 0x298   : > { %2810 = dma.done.wait (!%p2413_p2), %s2340_s14, 256  }
 0x299   : > { %2812 = vsyncadd (!%p2413_p2), %s2340_s14, 4294967040  ;;  %p12_p3 = scmp.ge.s32.totalorder %s2882_s15, 4   ;;  %s4397_s9 = smov %s2819_s10 }
 0x29a   : > { %s4398_s10 = smov %s2823_s11  ;;  %s4399_s11 = smov %s2893_s18 }
 0x29b   : > { %s4400_s12 = smov %s2882_s15  ;;  %14 = sbr.rel (!%p12_p3) target bundleno = 3 (0x3), region = 63 }
 0x2a2   :  { %2345 = vsyncpa [#allocation3], 1 }
 0x2a3   :  { %2347 = vsyncpa [#allocation3 + $0x1], 1 }

</bundles_post_ra>
